<compile_context>
chip_gen: v5e
topology: v5e:2x2
jax: 0.10.0
libtpu: 0.0.40
codegen_flags: <defaults>
</compile_context>

<pallas_src>
import jax
import jax.numpy as jnp
from jax.scipy import linalg as jsp_linalg
from jax.experimental import pallas as pl
from jax.experimental.pallas import tpu as pltpu

FEAT_CH = 16 + 3          # 19
IN_CH = FEAT_CH + 4       # 23
HID_N = 64


def _round_up(x, m):
    return (x + m - 1) // m * m


def _kaiming(key, shape_in_out):
    # weights stored as (in, out) for right-multiplication; kaiming fan_in = in
    fan_in = shape_in_out[0]
    return jax.random.normal(key, shape_in_out, dtype=jnp.float32) * jnp.sqrt(2.0 / fan_in)


def init_params(key):
    ks = jax.random.split(key, 8)
    p = {}
    p['Wv'] = _kaiming(ks[0], (4, FEAT_CH));           p['bv'] = jnp.zeros((1, FEAT_CH), jnp.float32)
    p['Wg'] = _kaiming(ks[1], (FEAT_CH * 3, 32));      p['bg'] = jnp.zeros((1, 32), jnp.float32)
    p['Waw'] = _kaiming(ks[2], (32, 1));               p['baw'] = jnp.zeros((1, 1), jnp.float32)
    p['Wf'] = _kaiming(ks[3], (32, 16));               p['bf'] = jnp.zeros((1, 16), jnp.float32)
    p['W0'] = _kaiming(ks[4], (16, HID_N));            p['b0'] = jnp.zeros((1, HID_N), jnp.float32)
    p['Ws'] = _kaiming(ks[5], (HID_N, 1));             p['bs'] = jnp.zeros((1, 1), jnp.float32)
    p['Wc1'] = _kaiming(ks[6], (HID_N + 16 + FEAT_CH + 4, HID_N))
    p['bc1'] = jnp.zeros((1, HID_N), jnp.float32)
    p['Wc2'] = _kaiming(ks[7], (HID_N, 1));            p['bc2'] = jnp.zeros((1, 1), jnp.float32)
    return p


def _pack_params(p, S, C, dtype):
    """Build lane-stacked (block-diag / tiled) weights so every per-view linear
    layer is a single matmul over all S views."""
    F = C - 4
    H = p['W0'].shape[1]

    def bd(blk):
        return jsp_linalg.block_diag(*([blk] * S))

    eyeF = jnp.eye(F, dtype=jnp.float32)

    # view_fc applied to the 4 dir channels of every view (zero rows for feat).
    Wdir_bd = bd(jnp.concatenate([jnp.zeros((F, F), jnp.float32), p['Wv']], axis=0))  # (S*C, S*F)
    bv_t = jnp.tile(p['bv'], (1, S))                                                  # (1, S*F)
    # per-view feature selector (img_feat_rgb part), lane-stacked.
    Sel = bd(jnp.concatenate([eyeF, jnp.zeros((4, F), jnp.float32)], axis=0))         # (S*C, S*F)

    Msum = jnp.tile(eyeF, (S, 1))                       # (S*F, F): sum over views
    Mmean = Msum / S
    Mvar = Msum / max(S - 1, 1)                         # torch.var unbiased; S==1 guarded
    TileF = jnp.tile(eyeF, (1, S))                      # (F, S*F): broadcast mean to all views

    Wg_ifr, Wg_var, Wg_mean = p['Wg'][:F], p['Wg'][F:2 * F], p['Wg'][2 * F:]
    Wgv_bd = bd(Wg_ifr)                                 # (S*F, S*32) per-view part
    Wgvar_t = jnp.tile(Wg_var, (1, S))                  # (F, S*32) shared part, computed once
    Wgmean_t = jnp.tile(Wg_mean, (1, S))
    bg_t = jnp.tile(p['bg'], (1, S))

    Waw_bd = bd(p['Waw'])                               # (S*32, S): one logit lane per view
    baw_t = jnp.tile(p['baw'], (1, S))
    T32 = bd(jnp.ones((1, 32), jnp.float32))            # (S, S*32): broadcast agg weight per view
    Wf_v = jnp.tile(p['Wf'], (S, 1))                    # (S*32, 16): weighted-sum + fc fused

    Wc1_h, Wc1_f, Wc1_v = p['Wc1'][:H], p['Wc1'][H:H + 16], p['Wc1'][H + 16:]
    Wc1h_t = jnp.tile(Wc1_h, (1, S))                    # shared h part (once per tile)
    Wc1f_t = jnp.tile(Wc1_f, (1, S))                    # shared f16 part (once per tile)
    Wc1v_bd = bd(Wc1_v)                                 # (S*C, S*H) per-view part
    bc1_t = jnp.tile(p['bc1'], (1, S))
    Wc2_bd = bd(p['Wc2'])                               # (S*H, S)
    bc2_t = jnp.tile(p['bc2'], (1, S))

    # rgb channels (img[..., -7:-4]) selection / weighting matrices.
    rgb_row = jnp.zeros((1, C), jnp.float32).at[0, F - 3:F].set(1.0)
    Rmask = bd(rgb_row)                                 # (S, S*C)
    rgb_sel = jnp.zeros((C, 3), jnp.float32)
    rgb_sel = rgb_sel.at[F - 3, 0].set(1.0).at[F - 2, 1].set(1.0).at[F - 1, 2].set(1.0)
    Rsel = jnp.tile(rgb_sel, (S, 1))                    # (S*C, 3)

    packed = (Wdir_bd, bv_t, Sel, Mmean, TileF, Mvar,
              Wgv_bd, Wgvar_t, Wgmean_t, bg_t, Waw_bd, baw_t, T32, Wf_v, p['bf'],
              p['W0'], p['b0'], p['Ws'], p['bs'],
              Wc1h_t, Wc1f_t, Wc1v_bd, bc1_t, Wc2_bd, bc2_t,
              Rmask, Rsel)
    return tuple(w.astype(dtype) for w in packed)


def nerf_kernel(x_ref,
                Wdir, bv, Sel, Mmean, TileF, Mvar,
                Wgv, Wgvar, Wgmean, bg, Waw, baw, T32, Wf, bf,
                W0, b0, Ws, bs,
                Wc1h, Wc1f, Wc1v, bc1, Wc2, bc2,
                Rmask, Rsel,
                out_ref):
    def mm(a, w_ref):
        return jnp.dot(a, w_ref[...], preferred_element_type=jnp.float32)

    def softmax_over_views(logits):               # (tm, S), views on lanes
        m = jnp.max(logits, axis=-1, keepdims=True)
        e = jnp.exp(logits - m)
        den = jnp.sum(e, axis=-1, keepdims=True)
        return e * pl.reciprocal(den, approx=True)

    x = x_ref[...]                                            # (tm, S*C)

    # ---------------- Agg ----------------
    vf = jax.nn.relu(mm(x, Wdir) + bv[...])                   # (tm, S*F) view_fc per view
    ifr = mm(x, Sel) + vf                                     # (tm, S*F) feat + view_fc
    mean = mm(ifr, Mmean)                                     # (tm, F)
    d = ifr - mm(mean, TileF)                                 # (tm, S*F)
    var = mm(d * d, Mvar)                                     # (tm, F)  unbiased
    gf = jax.nn.relu(mm(ifr, Wgv) + mm(var, Wgvar)
                     + mm(mean, Wgmean) + bg[...])            # (tm, S*32) global_fc
    aw = softmax_over_views(jax.nn.relu(mm(gf, Waw) + baw[...]))   # (tm, S)
    f16 = jax.nn.relu(mm(gf * mm(aw, T32), Wf) + bf[...])     # (tm, 16)  weighted sum + fc

    # ---------------- NeRF trunk ----------------
    h = jax.nn.relu(mm(f16, W0) + b0[...])                    # (tm, 64)  lr0 (lrs is empty)
    sigma = jax.nn.softplus(mm(h, Ws) + bs[...])              # (tm, 1)

    ch = jax.nn.relu(mm(h, Wc1h) + mm(f16, Wc1f)
                     + mm(x, Wc1v) + bc1[...])                # (tm, S*64) color layer 1
    cw = softmax_over_views(jax.nn.relu(mm(ch, Wc2) + bc2[...]))   # (tm, S)
    color = mm(x * mm(cw, Rmask), Rsel)                       # (tm, 3) weighted rgb

    out_ref[...] = jnp.concatenate([color, sigma], axis=-1)   # (tm, 4)


def nerf_forward(vox_feat, img_feat_rgb_dir, params, tm=1024,
                 compute_dtype=jnp.float32):
    """Forward pass. tm is the point tile (only tuning knob).
    compute_dtype=jnp.bfloat16 halves the HBM x-stream on v6e/v7x (accumulation
    stays f32); default keeps everything f32."""
    # vox_feat is unused by the reference forward (vox_img_feat = img_feat).
    del vox_feat
    B, N, S, C = img_feat_rgb_dir.shape
    M = B * N

    # Free reshape (no transpose, no extra HBM pass): one lane-dense row per point.
    x2 = img_feat_rgb_dir.reshape(M, S * C).astype(compute_dtype)
    packed = _pack_params(params, S, C, compute_dtype)

    tm_blk = max(8, min(tm, _round_up(M, 8)))
    grid = (pl.cdiv(M, tm_blk),)          # ragged last tile handled by Pallas masking

    in_specs = [pl.BlockSpec((tm_blk, S * C), lambda i: (i, 0))]
    in_specs += [pl.BlockSpec(w.shape, lambda i: (0, 0)) for w in packed]
    out_spec = pl.BlockSpec((tm_blk, 4), lambda i: (i, 0))
    # TODO(synk): a (4, M) lane-dense output (in-kernel transpose) would remove the
    # masked 4-lane stores; skipped since output traffic is ~4% of the input stream.

    out = pl.pallas_call(
        nerf_kernel,
        out_shape=jax.ShapeDtypeStruct((M, 4), jnp.float32),
        grid_spec=pltpu.PrefetchScalarGridSpec(
            num_scalar_prefetch=0,
            grid=grid,
            in_specs=in_specs,
            out_specs=out_spec,
        ),
        compiler_params=pltpu.CompilerParams(dimension_semantics=("parallel",)),
    )(x2, *packed)
    return out.reshape(B, N, 4)


def nerf_ref(img, p):
    # pure-JAX reference of the PyTorch forward (for sanity checking).
    B, N, S, C = img.shape
    dirs = img[..., -4:]
    fr = img[..., :-4]
    vf = jax.nn.relu(dirs @ p['Wv'] + p['bv'][0])
    ifr = fr + vf
    mean = jnp.mean(ifr, axis=-2, keepdims=True)
    var = jnp.sum((ifr - mean) ** 2, axis=-2, keepdims=True) / (S - 1)
    feat = jnp.concatenate(
        [ifr, jnp.broadcast_to(var, ifr.shape), jnp.broadcast_to(mean, ifr.shape)], -1)
    gf = jax.nn.relu(feat @ p['Wg'] + p['bg'][0])
    aw = jax.nn.softmax(jax.nn.relu(gf @ p['Waw'] + p['baw'][0]), axis=-2)
    imf = jnp.sum(gf * aw, axis=-2)
    f16 = jax.nn.relu(imf @ p['Wf'] + p['bf'][0])
    h = jax.nn.relu(f16 @ p['W0'] + p['b0'][0])
    sigma = jax.nn.softplus(h @ p['Ws'] + p['bs'][0])
    xcat = jnp.concatenate([h, f16], -1)
    xrep = jnp.broadcast_to(xcat[:, :, None, :], (B, N, S, xcat.shape[-1]))
    xs = jnp.concatenate([xrep, img], -1)
    ch = jax.nn.relu(xs @ p['Wc1'] + p['bc1'][0])
    cw = jax.nn.softmax(jax.nn.relu(ch @ p['Wc2'] + p['bc2'][0]), axis=-2)
    color = jnp.sum(img[..., -7:-4] * cw, axis=-2)
    return jnp.concatenate([color, sigma], -1)


if __name__ == "__main__":
    key = jax.random.PRNGKey(0)
    kp, kx, kv = jax.random.split(key, 3)

    B, N_points, N_views = 2, 8, 4
    params = init_params(kp)
    img_feat_rgb_dir = jax.random.normal(kx, (B, N_points, N_views, IN_CH), dtype=jnp.float32)
    vox_feat = jax.random.normal(kv, (B, N_points, 8), dtype=jnp.float32)  # unused (as in reference)

    out = nerf_forward(vox_feat, img_feat_rgb_dir, params)
    out = jax.block_until_ready(out)

    ref = nerf_ref(img_feat_rgb_dir, params)
    assert out.shape == (B, N_points, 4)
    assert jnp.allclose(out, ref, atol=5e-2, rtol=5e-2), \
        f"max abs diff {jnp.max(jnp.abs(out - ref))}"
    print("KERNEL_OK")
</pallas_src>

<mosaic_0001>
module attributes {stable_mosaic.version = 11 : i64} {
  func.func @nerf_kernel(%arg0: i32, %arg1: memref<16x92xf32, #tpu.memory_space<vmem>>, %arg2: memref<92x76xf32, #tpu.memory_space<vmem>>, %arg3: memref<1x76xf32, #tpu.memory_space<vmem>>, %arg4: memref<92x76xf32, #tpu.memory_space<vmem>>, %arg5: memref<76x19xf32, #tpu.memory_space<vmem>>, %arg6: memref<19x76xf32, #tpu.memory_space<vmem>>, %arg7: memref<76x19xf32, #tpu.memory_space<vmem>>, %arg8: memref<76x128xf32, #tpu.memory_space<vmem>>, %arg9: memref<19x128xf32, #tpu.memory_space<vmem>>, %arg10: memref<19x128xf32, #tpu.memory_space<vmem>>, %arg11: memref<1x128xf32, #tpu.memory_space<vmem>>, %arg12: memref<128x4xf32, #tpu.memory_space<vmem>>, %arg13: memref<1x4xf32, #tpu.memory_space<vmem>>, %arg14: memref<4x128xf32, #tpu.memory_space<vmem>>, %arg15: memref<128x16xf32, #tpu.memory_space<vmem>>, %arg16: memref<1x16xf32, #tpu.memory_space<vmem>>, %arg17: memref<16x64xf32, #tpu.memory_space<vmem>>, %arg18: memref<1x64xf32, #tpu.memory_space<vmem>>, %arg19: memref<64x1xf32, #tpu.memory_space<vmem>>, %arg20: memref<1x1xf32, #tpu.memory_space<vmem>>, %arg21: memref<64x256xf32, #tpu.memory_space<vmem>>, %arg22: memref<16x256xf32, #tpu.memory_space<vmem>>, %arg23: memref<92x256xf32, #tpu.memory_space<vmem>>, %arg24: memref<1x256xf32, #tpu.memory_space<vmem>>, %arg25: memref<256x4xf32, #tpu.memory_space<vmem>>, %arg26: memref<1x4xf32, #tpu.memory_space<vmem>>, %arg27: memref<4x92xf32, #tpu.memory_space<vmem>>, %arg28: memref<92x3xf32, #tpu.memory_space<vmem>>, %arg29: memref<16x4xf32, #tpu.memory_space<vmem>>) attributes {dimension_semantics = [#tpu.dimension_semantics<parallel>], iteration_bounds = array<i64: 1>, scalar_prefetch = 0 : i64, scratch_operands = 0 : i64, tpu.core_type = #tpu.core_type<tc>, window_params = [{transform_indices = @transform_0, window_bounds = array<i64: 16, 92>}, {pipeline_mode = #tpu.pipeline_mode<synchronous>, transform_indices = @transform_1, window_bounds = array<i64: 92, 76>}, {pipeline_mode = #tpu.pipeline_mode<synchronous>, transform_indices = @transform_2, window_bounds = array<i64: 1, 76>}, {pipeline_mode = #tpu.pipeline_mode<synchronous>, transform_indices = @transform_3, window_bounds = array<i64: 92, 76>}, {pipeline_mode = #tpu.pipeline_mode<synchronous>, transform_indices = @transform_4, window_bounds = array<i64: 76, 19>}, {pipeline_mode = #tpu.pipeline_mode<synchronous>, transform_indices = @transform_5, window_bounds = array<i64: 19, 76>}, {pipeline_mode = #tpu.pipeline_mode<synchronous>, transform_indices = @transform_6, window_bounds = array<i64: 76, 19>}, {pipeline_mode = #tpu.pipeline_mode<synchronous>, transform_indices = @transform_7, window_bounds = array<i64: 76, 128>}, {pipeline_mode = #tpu.pipeline_mode<synchronous>, transform_indices = @transform_8, window_bounds = array<i64: 19, 128>}, {pipeline_mode = #tpu.pipeline_mode<synchronous>, transform_indices = @transform_9, window_bounds = array<i64: 19, 128>}, {pipeline_mode = #tpu.pipeline_mode<synchronous>, transform_indices = @transform_10, window_bounds = array<i64: 1, 128>}, {pipeline_mode = #tpu.pipeline_mode<synchronous>, transform_indices = @transform_11, window_bounds = array<i64: 128, 4>}, {pipeline_mode = #tpu.pipeline_mode<synchronous>, transform_indices = @transform_12, window_bounds = array<i64: 1, 4>}, {pipeline_mode = #tpu.pipeline_mode<synchronous>, transform_indices = @transform_13, window_bounds = array<i64: 4, 128>}, {pipeline_mode = #tpu.pipeline_mode<synchronous>, transform_indices = @transform_14, window_bounds = array<i64: 128, 16>}, {pipeline_mode = #tpu.pipeline_mode<synchronous>, transform_indices = @transform_15, window_bounds = array<i64: 1, 16>}, {pipeline_mode = #tpu.pipeline_mode<synchronous>, transform_indices = @transform_16, window_bounds = array<i64: 16, 64>}, {pipeline_mode = #tpu.pipeline_mode<synchronous>, transform_indices = @transform_17, window_bounds = array<i64: 1, 64>}, {pipeline_mode = #tpu.pipeline_mode<synchronous>, transform_indices = @transform_18, window_bounds = array<i64: 64, 1>}, {pipeline_mode = #tpu.pipeline_mode<synchronous>, transform_indices = @transform_19, window_bounds = array<i64: 1, 1>}, {pipeline_mode = #tpu.pipeline_mode<synchronous>, transform_indices = @transform_20, window_bounds = array<i64: 64, 256>}, {pipeline_mode = #tpu.pipeline_mode<synchronous>, transform_indices = @transform_21, window_bounds = array<i64: 16, 256>}, {pipeline_mode = #tpu.pipeline_mode<synchronous>, transform_indices = @transform_22, window_bounds = array<i64: 92, 256>}, {pipeline_mode = #tpu.pipeline_mode<synchronous>, transform_indices = @transform_23, window_bounds = array<i64: 1, 256>}, {pipeline_mode = #tpu.pipeline_mode<synchronous>, transform_indices = @transform_24, window_bounds = array<i64: 256, 4>}, {pipeline_mode = #tpu.pipeline_mode<synchronous>, transform_indices = @transform_25, window_bounds = array<i64: 1, 4>}, {pipeline_mode = #tpu.pipeline_mode<synchronous>, transform_indices = @transform_26, window_bounds = array<i64: 4, 92>}, {pipeline_mode = #tpu.pipeline_mode<synchronous>, transform_indices = @transform_27, window_bounds = array<i64: 92, 3>}, {transform_indices = @transform_28, window_bounds = array<i64: 16, 4>}]} {
    %c0 = arith.constant 0 : index
    %c0_0 = arith.constant 0 : index
    %0 = vector.load %arg1[%c0, %c0_0] : memref<16x92xf32, #tpu.memory_space<vmem>>, vector<16x92xf32>
    %c0_1 = arith.constant 0 : index
    %c0_2 = arith.constant 0 : index
    %1 = vector.load %arg2[%c0_1, %c0_2] : memref<92x76xf32, #tpu.memory_space<vmem>>, vector<92x76xf32>
    %cst = arith.constant dense<0.000000e+00> : vector<16x76xf32>
    %2 = tpu.matmul %0, %1, %cst {dimension_numbers = #tpu.dot_dimension_numbers<[1], [0], [0], [1], [0, 0, 1, 1], [], []>} : vector<16x92xf32>, vector<92x76xf32>, vector<16x76xf32> -> vector<16x76xf32>
    %c0_3 = arith.constant 0 : index
    %c0_4 = arith.constant 0 : index
    %3 = vector.load %arg3[%c0_3, %c0_4] : memref<1x76xf32, #tpu.memory_space<vmem>>, vector<1x76xf32>
    %4 = vector.broadcast %3 : vector<1x76xf32> to vector<16x76xf32>
    %5 = arith.addf %2, %4 : vector<16x76xf32>
    %cst_5 = arith.constant 0.000000e+00 : f32
    %6 = vector.broadcast %cst_5 : f32 to vector<16x76xf32>
    %7 = arith.maximumf %5, %6 : vector<16x76xf32>
    %c0_6 = arith.constant 0 : index
    %c0_7 = arith.constant 0 : index
    %8 = vector.load %arg4[%c0_6, %c0_7] : memref<92x76xf32, #tpu.memory_space<vmem>>, vector<92x76xf32>
    %cst_8 = arith.constant dense<0.000000e+00> : vector<16x76xf32>
    %9 = tpu.matmul %0, %8, %cst_8 {dimension_numbers = #tpu.dot_dimension_numbers<[1], [0], [0], [1], [0, 0, 1, 1], [], []>} : vector<16x92xf32>, vector<92x76xf32>, vector<16x76xf32> -> vector<16x76xf32>
    %10 = arith.addf %9, %7 : vector<16x76xf32>
    %c0_9 = arith.constant 0 : index
    %c0_10 = arith.constant 0 : index
    %11 = vector.load %arg5[%c0_9, %c0_10] : memref<76x19xf32, #tpu.memory_space<vmem>>, vector<76x19xf32>
    %cst_11 = arith.constant dense<0.000000e+00> : vector<16x19xf32>
    %12 = tpu.matmul %10, %11, %cst_11 {dimension_numbers = #tpu.dot_dimension_numbers<[1], [0], [0], [1], [0, 0, 1, 1], [], []>} : vector<16x76xf32>, vector<76x19xf32>, vector<16x19xf32> -> vector<16x19xf32>
    %c0_12 = arith.constant 0 : index
    %c0_13 = arith.constant 0 : index
    %13 = vector.load %arg6[%c0_12, %c0_13] : memref<19x76xf32, #tpu.memory_space<vmem>>, vector<19x76xf32>
    %cst_14 = arith.constant dense<0.000000e+00> : vector<16x76xf32>
    %14 = tpu.matmul %12, %13, %cst_14 {dimension_numbers = #tpu.dot_dimension_numbers<[1], [0], [0], [1], [0, 0, 1, 1], [], []>} : vector<16x19xf32>, vector<19x76xf32>, vector<16x76xf32> -> vector<16x76xf32>
    %15 = arith.subf %10, %14 : vector<16x76xf32>
    %16 = arith.mulf %15, %15 : vector<16x76xf32>
    %c0_15 = arith.constant 0 : index
    %c0_16 = arith.constant 0 : index
    %17 = vector.load %arg7[%c0_15, %c0_16] : memref<76x19xf32, #tpu.memory_space<vmem>>, vector<76x19xf32>
    %cst_17 = arith.constant dense<0.000000e+00> : vector<16x19xf32>
    %18 = tpu.matmul %16, %17, %cst_17 {dimension_numbers = #tpu.dot_dimension_numbers<[1], [0], [0], [1], [0, 0, 1, 1], [], []>} : vector<16x76xf32>, vector<76x19xf32>, vector<16x19xf32> -> vector<16x19xf32>
    %c0_18 = arith.constant 0 : index
    %c0_19 = arith.constant 0 : index
    %19 = vector.load %arg8[%c0_18, %c0_19] : memref<76x128xf32, #tpu.memory_space<vmem>>, vector<76x128xf32>
    %cst_20 = arith.constant dense<0.000000e+00> : vector<16x128xf32>
    %20 = tpu.matmul %10, %19, %cst_20 {dimension_numbers = #tpu.dot_dimension_numbers<[1], [0], [0], [1], [0, 0, 1, 1], [], []>} : vector<16x76xf32>, vector<76x128xf32>, vector<16x128xf32> -> vector<16x128xf32>
    %c0_21 = arith.constant 0 : index
    %c0_22 = arith.constant 0 : index
    %21 = vector.load %arg9[%c0_21, %c0_22] : memref<19x128xf32, #tpu.memory_space<vmem>>, vector<19x128xf32>
    %cst_23 = arith.constant dense<0.000000e+00> : vector<16x128xf32>
    %22 = tpu.matmul %18, %21, %cst_23 {dimension_numbers = #tpu.dot_dimension_numbers<[1], [0], [0], [1], [0, 0, 1, 1], [], []>} : vector<16x19xf32>, vector<19x128xf32>, vector<16x128xf32> -> vector<16x128xf32>
    %23 = arith.addf %20, %22 : vector<16x128xf32>
    %c0_24 = arith.constant 0 : index
    %c0_25 = arith.constant 0 : index
    %24 = vector.load %arg10[%c0_24, %c0_25] : memref<19x128xf32, #tpu.memory_space<vmem>>, vector<19x128xf32>
    %cst_26 = arith.constant dense<0.000000e+00> : vector<16x128xf32>
    %25 = tpu.matmul %12, %24, %cst_26 {dimension_numbers = #tpu.dot_dimension_numbers<[1], [0], [0], [1], [0, 0, 1, 1], [], []>} : vector<16x19xf32>, vector<19x128xf32>, vector<16x128xf32> -> vector<16x128xf32>
    %26 = arith.addf %23, %25 : vector<16x128xf32>
    %c0_27 = arith.constant 0 : index
    %c0_28 = arith.constant 0 : index
    %27 = vector.load %arg11[%c0_27, %c0_28] : memref<1x128xf32, #tpu.memory_space<vmem>>, vector<1x128xf32>
    %28 = vector.broadcast %27 : vector<1x128xf32> to vector<16x128xf32>
    %29 = arith.addf %26, %28 : vector<16x128xf32>
    %cst_29 = arith.constant 0.000000e+00 : f32
    %30 = vector.broadcast %cst_29 : f32 to vector<16x128xf32>
    %31 = arith.maximumf %29, %30 : vector<16x128xf32>
    %c0_30 = arith.constant 0 : index
    %c0_31 = arith.constant 0 : index
    %32 = vector.load %arg12[%c0_30, %c0_31] : memref<128x4xf32, #tpu.memory_space<vmem>>, vector<128x4xf32>
    %cst_32 = arith.constant dense<0.000000e+00> : vector<16x4xf32>
    %33 = tpu.matmul %31, %32, %cst_32 {dimension_numbers = #tpu.dot_dimension_numbers<[1], [0], [0], [1], [0, 0, 1, 1], [], []>} : vector<16x128xf32>, vector<128x4xf32>, vector<16x4xf32> -> vector<16x4xf32>
    %c0_33 = arith.constant 0 : index
    %c0_34 = arith.constant 0 : index
    %34 = vector.load %arg13[%c0_33, %c0_34] : memref<1x4xf32, #tpu.memory_space<vmem>>, vector<1x4xf32>
    %35 = vector.broadcast %34 : vector<1x4xf32> to vector<16x4xf32>
    %36 = arith.addf %33, %35 : vector<16x4xf32>
    %cst_35 = arith.constant 0.000000e+00 : f32
    %37 = vector.broadcast %cst_35 : f32 to vector<16x4xf32>
    %38 = arith.maximumf %36, %37 : vector<16x4xf32>
    %cst_36 = arith.constant dense<0xFF800000> : vector<16xf32>
    %39 = vector.multi_reduction <maximumf>, %38, %cst_36 [1] : vector<16x4xf32> to vector<16xf32>
    %40 = vector.shape_cast %39 : vector<16xf32> to vector<16x1xf32>
    %41 = vector.broadcast %40 : vector<16x1xf32> to vector<16x4xf32>
    %42 = arith.subf %38, %41 : vector<16x4xf32>
    %43 = math.exp %42 : vector<16x4xf32>
    %cst_37 = arith.constant dense<0.000000e+00> : vector<16xf32>
    %44 = vector.multi_reduction <add>, %43, %cst_37 [1] : vector<16x4xf32> to vector<16xf32>
    %45 = vector.shape_cast %44 : vector<16xf32> to vector<16x1xf32>
    %46 = tpu.reciprocal %45 {approx = true} : vector<16x1xf32> -> vector<16x1xf32>
    %47 = vector.broadcast %46 : vector<16x1xf32> to vector<16x4xf32>
    %48 = arith.mulf %43, %47 : vector<16x4xf32>
    %c0_38 = arith.constant 0 : index
    %c0_39 = arith.constant 0 : index
    %49 = vector.load %arg14[%c0_38, %c0_39] : memref<4x128xf32, #tpu.memory_space<vmem>>, vector<4x128xf32>
    %cst_40 = arith.constant dense<0.000000e+00> : vector<16x128xf32>
    %50 = tpu.matmul %48, %49, %cst_40 {dimension_numbers = #tpu.dot_dimension_numbers<[1], [0], [0], [1], [0, 0, 1, 1], [], []>} : vector<16x4xf32>, vector<4x128xf32>, vector<16x128xf32> -> vector<16x128xf32>
    %51 = arith.mulf %31, %50 : vector<16x128xf32>
    %c0_41 = arith.constant 0 : index
    %c0_42 = arith.constant 0 : index
    %52 = vector.load %arg15[%c0_41, %c0_42] : memref<128x16xf32, #tpu.memory_space<vmem>>, vector<128x16xf32>
    %cst_43 = arith.constant dense<0.000000e+00> : vector<16x16xf32>
    %53 = tpu.matmul %51, %52, %cst_43 {dimension_numbers = #tpu.dot_dimension_numbers<[1], [0], [0], [1], [0, 0, 1, 1], [], []>} : vector<16x128xf32>, vector<128x16xf32>, vector<16x16xf32> -> vector<16x16xf32>
    %c0_44 = arith.constant 0 : index
    %c0_45 = arith.constant 0 : index
    %54 = vector.load %arg16[%c0_44, %c0_45] : memref<1x16xf32, #tpu.memory_space<vmem>>, vector<1x16xf32>
    %55 = vector.broadcast %54 : vector<1x16xf32> to vector<16x16xf32>
    %56 = arith.addf %53, %55 : vector<16x16xf32>
    %cst_46 = arith.constant 0.000000e+00 : f32
    %57 = vector.broadcast %cst_46 : f32 to vector<16x16xf32>
    %58 = arith.maximumf %56, %57 : vector<16x16xf32>
    %c0_47 = arith.constant 0 : index
    %c0_48 = arith.constant 0 : index
    %59 = vector.load %arg17[%c0_47, %c0_48] : memref<16x64xf32, #tpu.memory_space<vmem>>, vector<16x64xf32>
    %cst_49 = arith.constant dense<0.000000e+00> : vector<16x64xf32>
    %60 = tpu.matmul %58, %59, %cst_49 {dimension_numbers = #tpu.dot_dimension_numbers<[1], [0], [0], [1], [0, 0, 1, 1], [], []>} : vector<16x16xf32>, vector<16x64xf32>, vector<16x64xf32> -> vector<16x64xf32>
    %c0_50 = arith.constant 0 : index
    %c0_51 = arith.constant 0 : index
    %61 = vector.load %arg18[%c0_50, %c0_51] : memref<1x64xf32, #tpu.memory_space<vmem>>, vector<1x64xf32>
    %62 = vector.broadcast %61 : vector<1x64xf32> to vector<16x64xf32>
    %63 = arith.addf %60, %62 : vector<16x64xf32>
    %cst_52 = arith.constant 0.000000e+00 : f32
    %64 = vector.broadcast %cst_52 : f32 to vector<16x64xf32>
    %65 = arith.maximumf %63, %64 : vector<16x64xf32>
    %c0_53 = arith.constant 0 : index
    %c0_54 = arith.constant 0 : index
    %66 = vector.load %arg19[%c0_53, %c0_54] : memref<64x1xf32, #tpu.memory_space<vmem>>, vector<64x1xf32>
    %cst_55 = arith.constant dense<0.000000e+00> : vector<16x1xf32>
    %67 = tpu.matmul %65, %66, %cst_55 {dimension_numbers = #tpu.dot_dimension_numbers<[1], [0], [0], [1], [0, 0, 1, 1], [], []>} : vector<16x64xf32>, vector<64x1xf32>, vector<16x1xf32> -> vector<16x1xf32>
    %c0_56 = arith.constant 0 : index
    %c0_57 = arith.constant 0 : index
    %68 = vector.load %arg20[%c0_56, %c0_57] : memref<1x1xf32, #tpu.memory_space<vmem>>, vector<1x1xf32>
    %69 = vector.broadcast %68 : vector<1x1xf32> to vector<16x1xf32>
    %70 = arith.addf %67, %69 : vector<16x1xf32>
    %cst_58 = arith.constant 0.000000e+00 : f32
    %71 = vector.broadcast %cst_58 : f32 to vector<16x1xf32>
    %72 = arith.maximumf %70, %71 : vector<16x1xf32>
    %73 = vector.broadcast %cst_58 : f32 to vector<16x1xf32>
    %74 = arith.subf %70, %73 : vector<16x1xf32>
    %75 = arith.cmpf one, %74, %74 : vector<16x1xf32>
    %76 = vector.broadcast %cst_58 : f32 to vector<16x1xf32>
    %77 = arith.addf %70, %76 : vector<16x1xf32>
    %78 = math.absf %74 : vector<16x1xf32>
    %cst_59 = arith.constant 0.000000e+00 : f32
    %79 = vector.broadcast %cst_59 : f32 to vector<16x1xf32>
    %80 = arith.subf %79, %78 : vector<16x1xf32>
    %81 = math.exp %80 : vector<16x1xf32>
    %82 = math.log1p %81 : vector<16x1xf32>
    %83 = arith.addf %72, %82 : vector<16x1xf32>
    %84 = arith.select %75, %77, %83 : vector<16x1xi1>, vector<16x1xf32>
    %c0_60 = arith.constant 0 : index
    %c0_61 = arith.constant 0 : index
    %85 = vector.load %arg21[%c0_60, %c0_61] : memref<64x256xf32, #tpu.memory_space<vmem>>, vector<64x256xf32>
    %cst_62 = arith.constant dense<0.000000e+00> : vector<16x256xf32>
    %86 = tpu.matmul %65, %85, %cst_62 {dimension_numbers = #tpu.dot_dimension_numbers<[1], [0], [0], [1], [0, 0, 1, 1], [], []>} : vector<16x64xf32>, vector<64x256xf32>, vector<16x256xf32> -> vector<16x256xf32>
    %c0_63 = arith.constant 0 : index
    %c0_64 = arith.constant 0 : index
    %87 = vector.load %arg22[%c0_63, %c0_64] : memref<16x256xf32, #tpu.memory_space<vmem>>, vector<16x256xf32>
    %cst_65 = arith.constant dense<0.000000e+00> : vector<16x256xf32>
    %88 = tpu.matmul %58, %87, %cst_65 {dimension_numbers = #tpu.dot_dimension_numbers<[1], [0], [0], [1], [0, 0, 1, 1], [], []>} : vector<16x16xf32>, vector<16x256xf32>, vector<16x256xf32> -> vector<16x256xf32>
    %89 = arith.addf %86, %88 : vector<16x256xf32>
    %c0_66 = arith.constant 0 : index
    %c0_67 = arith.constant 0 : index
    %90 = vector.load %arg23[%c0_66, %c0_67] : memref<92x256xf32, #tpu.memory_space<vmem>>, vector<92x256xf32>
    %cst_68 = arith.constant dense<0.000000e+00> : vector<16x256xf32>
    %91 = tpu.matmul %0, %90, %cst_68 {dimension_numbers = #tpu.dot_dimension_numbers<[1], [0], [0], [1], [0, 0, 1, 1], [], []>} : vector<16x92xf32>, vector<92x256xf32>, vector<16x256xf32> -> vector<16x256xf32>
    %92 = arith.addf %89, %91 : vector<16x256xf32>
    %c0_69 = arith.constant 0 : index
    %c0_70 = arith.constant 0 : index
    %93 = vector.load %arg24[%c0_69, %c0_70] : memref<1x256xf32, #tpu.memory_space<vmem>>, vector<1x256xf32>
    %94 = vector.broadcast %93 : vector<1x256xf32> to vector<16x256xf32>
    %95 = arith.addf %92, %94 : vector<16x256xf32>
    %cst_71 = arith.constant 0.000000e+00 : f32
    %96 = vector.broadcast %cst_71 : f32 to vector<16x256xf32>
    %97 = arith.maximumf %95, %96 : vector<16x256xf32>
    %c0_72 = arith.constant 0 : index
    %c0_73 = arith.constant 0 : index
    %98 = vector.load %arg25[%c0_72, %c0_73] : memref<256x4xf32, #tpu.memory_space<vmem>>, vector<256x4xf32>
    %cst_74 = arith.constant dense<0.000000e+00> : vector<16x4xf32>
    %99 = tpu.matmul %97, %98, %cst_74 {dimension_numbers = #tpu.dot_dimension_numbers<[1], [0], [0], [1], [0, 0, 1, 1], [], []>} : vector<16x256xf32>, vector<256x4xf32>, vector<16x4xf32> -> vector<16x4xf32>
    %c0_75 = arith.constant 0 : index
    %c0_76 = arith.constant 0 : index
    %100 = vector.load %arg26[%c0_75, %c0_76] : memref<1x4xf32, #tpu.memory_space<vmem>>, vector<1x4xf32>
    %101 = vector.broadcast %100 : vector<1x4xf32> to vector<16x4xf32>
    %102 = arith.addf %99, %101 : vector<16x4xf32>
    %cst_77 = arith.constant 0.000000e+00 : f32
    %103 = vector.broadcast %cst_77 : f32 to vector<16x4xf32>
    %104 = arith.maximumf %102, %103 : vector<16x4xf32>
    %cst_78 = arith.constant dense<0xFF800000> : vector<16xf32>
    %105 = vector.multi_reduction <maximumf>, %104, %cst_78 [1] : vector<16x4xf32> to vector<16xf32>
    %106 = vector.shape_cast %105 : vector<16xf32> to vector<16x1xf32>
    %107 = vector.broadcast %106 : vector<16x1xf32> to vector<16x4xf32>
    %108 = arith.subf %104, %107 : vector<16x4xf32>
    %109 = math.exp %108 : vector<16x4xf32>
    %cst_79 = arith.constant dense<0.000000e+00> : vector<16xf32>
    %110 = vector.multi_reduction <add>, %109, %cst_79 [1] : vector<16x4xf32> to vector<16xf32>
    %111 = vector.shape_cast %110 : vector<16xf32> to vector<16x1xf32>
    %112 = tpu.reciprocal %111 {approx = true} : vector<16x1xf32> -> vector<16x1xf32>
    %113 = vector.broadcast %112 : vector<16x1xf32> to vector<16x4xf32>
    %114 = arith.mulf %109, %113 : vector<16x4xf32>
    %c0_80 = arith.constant 0 : index
    %c0_81 = arith.constant 0 : index
    %115 = vector.load %arg27[%c0_80, %c0_81] : memref<4x92xf32, #tpu.memory_space<vmem>>, vector<4x92xf32>
    %cst_82 = arith.constant dense<0.000000e+00> : vector<16x92xf32>
    %116 = tpu.matmul %114, %115, %cst_82 {dimension_numbers = #tpu.dot_dimension_numbers<[1], [0], [0], [1], [0, 0, 1, 1], [], []>} : vector<16x4xf32>, vector<4x92xf32>, vector<16x92xf32> -> vector<16x92xf32>
    %117 = arith.mulf %0, %116 : vector<16x92xf32>
    %c0_83 = arith.constant 0 : index
    %c0_84 = arith.constant 0 : index
    %118 = vector.load %arg28[%c0_83, %c0_84] : memref<92x3xf32, #tpu.memory_space<vmem>>, vector<92x3xf32>
    %cst_85 = arith.constant dense<0.000000e+00> : vector<16x3xf32>
    %119 = tpu.matmul %117, %118, %cst_85 {dimension_numbers = #tpu.dot_dimension_numbers<[1], [0], [0], [1], [0, 0, 1, 1], [], []>} : vector<16x92xf32>, vector<92x3xf32>, vector<16x3xf32> -> vector<16x3xf32>
    %120 = tpu.concatenate %119, %84 in 1 : vector<16x3xf32>, vector<16x1xf32> -> vector<16x4xf32>
    %c0_86 = arith.constant 0 : index
    %c0_87 = arith.constant 0 : index
    %121 = vector.load %arg29[%c0_86, %c0_87] : memref<16x4xf32, #tpu.memory_space<vmem>>, vector<16x4xf32>
    tpu.vector_store %arg29[%c0_86, %c0_87], %120 {strides = array<i32>} : memref<16x4xf32, #tpu.memory_space<vmem>>, vector<16x4xf32>,
    return
  }
  func.func @transform_0(%arg0: i32) -> (i32, i32) {
    %c0_i32 = arith.constant 0 : i32
    %c0_i32_0 = arith.constant 0 : i32
    return %arg0, %c0_i32 : i32, i32
  }
  func.func @transform_1(%arg0: i32) -> (i32, i32) {
    %c0_i32 = arith.constant 0 : i32
    %c0_i32_0 = arith.constant 0 : i32
    %c0_i32_1 = arith.constant 0 : i32
    return %c0_i32, %c0_i32_0 : i32, i32
  }
  func.func @transform_2(%arg0: i32) -> (i32, i32) {
    %c0_i32 = arith.constant 0 : i32
    %c0_i32_0 = arith.constant 0 : i32
    %c0_i32_1 = arith.constant 0 : i32
    return %c0_i32, %c0_i32_0 : i32, i32
  }
  func.func @transform_3(%arg0: i32) -> (i32, i32) {
    %c0_i32 = arith.constant 0 : i32
    %c0_i32_0 = arith.constant 0 : i32
    %c0_i32_1 = arith.constant 0 : i32
    return %c0_i32, %c0_i32_0 : i32, i32
  }
  func.func @transform_4(%arg0: i32) -> (i32, i32) {
    %c0_i32 = arith.constant 0 : i32
    %c0_i32_0 = arith.constant 0 : i32
    %c0_i32_1 = arith.constant 0 : i32
    return %c0_i32, %c0_i32_0 : i32, i32
  }
  func.func @transform_5(%arg0: i32) -> (i32, i32) {
    %c0_i32 = arith.constant 0 : i32
    %c0_i32_0 = arith.constant 0 : i32
    %c0_i32_1 = arith.constant 0 : i32
    return %c0_i32, %c0_i32_0 : i32, i32
  }
  func.func @transform_6(%arg0: i32) -> (i32, i32) {
    %c0_i32 = arith.constant 0 : i32
    %c0_i32_0 = arith.constant 0 : i32
    %c0_i32_1 = arith.constant 0 : i32
    return %c0_i32, %c0_i32_0 : i32, i32
  }
  func.func @transform_7(%arg0: i32) -> (i32, i32) {
    %c0_i32 = arith.constant 0 : i32
    %c0_i32_0 = arith.constant 0 : i32
    %c0_i32_1 = arith.constant 0 : i32
    return %c0_i32, %c0_i32_0 : i32, i32
  }
  func.func @transform_8(%arg0: i32) -> (i32, i32) {
    %c0_i32 = arith.constant 0 : i32
    %c0_i32_0 = arith.constant 0 : i32
    %c0_i32_1 = arith.constant 0 : i32
    return %c0_i32, %c0_i32_0 : i32, i32
  }
  func.func @transform_9(%arg0: i32) -> (i32, i32) {
    %c0_i32 = arith.constant 0 : i32
    %c0_i32_0 = arith.constant 0 : i32
    %c0_i32_1 = arith.constant 0 : i32
    return %c0_i32, %c0_i32_0 : i32, i32
  }
  func.func @transform_10(%arg0: i32) -> (i32, i32) {
    %c0_i32 = arith.constant 0 : i32
    %c0_i32_0 = arith.constant 0 : i32
    %c0_i32_1 = arith.constant 0 : i32
    return %c0_i32, %c0_i32_0 : i32, i32
  }
  func.func @transform_11(%arg0: i32) -> (i32, i32) {
    %c0_i32 = arith.constant 0 : i32
    %c0_i32_0 = arith.constant 0 : i32
    %c0_i32_1 = arith.constant 0 : i32
    return %c0_i32, %c0_i32_0 : i32, i32
  }
  func.func @transform_12(%arg0: i32) -> (i32, i32) {
    %c0_i32 = arith.constant 0 : i32
    %c0_i32_0 = arith.constant 0 : i32
    %c0_i32_1 = arith.constant 0 : i32
    return %c0_i32, %c0_i32_0 : i32, i32
  }
  func.func @transform_13(%arg0: i32) -> (i32, i32) {
    %c0_i32 = arith.constant 0 : i32
    %c0_i32_0 = arith.constant 0 : i32
    %c0_i32_1 = arith.constant 0 : i32
    return %c0_i32, %c0_i32_0 : i32, i32
  }
  func.func @transform_14(%arg0: i32) -> (i32, i32) {
    %c0_i32 = arith.constant 0 : i32
    %c0_i32_0 = arith.constant 0 : i32
    %c0_i32_1 = arith.constant 0 : i32
    return %c0_i32, %c0_i32_0 : i32, i32
  }
  func.func @transform_15(%arg0: i32) -> (i32, i32) {
    %c0_i32 = arith.constant 0 : i32
    %c0_i32_0 = arith.constant 0 : i32
    %c0_i32_1 = arith.constant 0 : i32
    return %c0_i32, %c0_i32_0 : i32, i32
  }
  func.func @transform_16(%arg0: i32) -> (i32, i32) {
    %c0_i32 = arith.constant 0 : i32
    %c0_i32_0 = arith.constant 0 : i32
    %c0_i32_1 = arith.constant 0 : i32
    return %c0_i32, %c0_i32_0 : i32, i32
  }
  func.func @transform_17(%arg0: i32) -> (i32, i32) {
    %c0_i32 = arith.constant 0 : i32
    %c0_i32_0 = arith.constant 0 : i32
    %c0_i32_1 = arith.constant 0 : i32
    return %c0_i32, %c0_i32_0 : i32, i32
  }
  func.func @transform_18(%arg0: i32) -> (i32, i32) {
    %c0_i32 = arith.constant 0 : i32
    %c0_i32_0 = arith.constant 0 : i32
    %c0_i32_1 = arith.constant 0 : i32
    return %c0_i32, %c0_i32_0 : i32, i32
  }
  func.func @transform_19(%arg0: i32) -> (i32, i32) {
    %c0_i32 = arith.constant 0 : i32
    %c0_i32_0 = arith.constant 0 : i32
    %c0_i32_1 = arith.constant 0 : i32
    return %c0_i32, %c0_i32_0 : i32, i32
  }
  func.func @transform_20(%arg0: i32) -> (i32, i32) {
    %c0_i32 = arith.constant 0 : i32
    %c0_i32_0 = arith.constant 0 : i32
    %c0_i32_1 = arith.constant 0 : i32
    return %c0_i32, %c0_i32_0 : i32, i32
  }
  func.func @transform_21(%arg0: i32) -> (i32, i32) {
    %c0_i32 = arith.constant 0 : i32
    %c0_i32_0 = arith.constant 0 : i32
    %c0_i32_1 = arith.constant 0 : i32
    return %c0_i32, %c0_i32_0 : i32, i32
  }
  func.func @transform_22(%arg0: i32) -> (i32, i32) {
    %c0_i32 = arith.constant 0 : i32
    %c0_i32_0 = arith.constant 0 : i32
    %c0_i32_1 = arith.constant 0 : i32
    return %c0_i32, %c0_i32_0 : i32, i32
  }
  func.func @transform_23(%arg0: i32) -> (i32, i32) {
    %c0_i32 = arith.constant 0 : i32
    %c0_i32_0 = arith.constant 0 : i32
    %c0_i32_1 = arith.constant 0 : i32
    return %c0_i32, %c0_i32_0 : i32, i32
  }
  func.func @transform_24(%arg0: i32) -> (i32, i32) {
    %c0_i32 = arith.constant 0 : i32
    %c0_i32_0 = arith.constant 0 : i32
    %c0_i32_1 = arith.constant 0 : i32
    return %c0_i32, %c0_i32_0 : i32, i32
  }
  func.func @transform_25(%arg0: i32) -> (i32, i32) {
    %c0_i32 = arith.constant 0 : i32
    %c0_i32_0 = arith.constant 0 : i32
    %c0_i32_1 = arith.constant 0 : i32
    return %c0_i32, %c0_i32_0 : i32, i32
  }
  func.func @transform_26(%arg0: i32) -> (i32, i32) {
    %c0_i32 = arith.constant 0 : i32
    %c0_i32_0 = arith.constant 0 : i32
    %c0_i32_1 = arith.constant 0 : i32
    return %c0_i32, %c0_i32_0 : i32, i32
  }
  func.func @transform_27(%arg0: i32) -> (i32, i32) {
    %c0_i32 = arith.constant 0 : i32
    %c0_i32_0 = arith.constant 0 : i32
    %c0_i32_1 = arith.constant 0 : i32
    return %c0_i32, %c0_i32_0 : i32, i32
  }
  func.func @transform_28(%arg0: i32) -> (i32, i32) {
    %c0_i32 = arith.constant 0 : i32
    %c0_i32_0 = arith.constant 0 : i32
    return %arg0, %c0_i32 : i32, i32
  }
}

</mosaic_0001>

<bundles_post_ra>
// kernel: tpu_custom_call.1
= control target key start
LH: loop header
LB: loop body
LE: loop exit
PB: predicated region body
PF: predicated region fallthrough
CT: control target
= control target key end

     0   :  { %vm116_vm0 = vcmask 1043456   ;;  %vm109_vm1 = vcmask 752640   ;;  %vm193_vm2 = vcmask 621568   ;;  %vm236_vm3 = vcmask 1042432   ;;  %s2047_s1 = inlined_call_operand.vmem [shape: f32[92,76], index: 1, kind: input, shape index: {}]   ;;  %s2048_s3 = inlined_call_operand.vmem [shape: f32[92,76], index: 3, kind: input, shape index: {}]   ;;  %s2049_s4 = inlined_call_operand.vmem [shape: f32[76,19], index: 4, kind: input, shape index: {}]   ;;  %s2050_s2 = inlined_call_operand.vmem [shape: f32[1,76], index: 2, kind: input, shape index: {}]   ;;  %s2051_s0 = inlined_call_operand.vmem [shape: f32[16,92], index: 0, kind: input, shape index: {}]   ;;  %s2052_s7 = inlined_call_operand.vmem [shape: f32[76,128], index: 7, kind: input, shape index: {}]   ;;  %s2053_s5 = inlined_call_operand.vmem [shape: f32[19,76], index: 5, kind: input, shape index: {}]   ;;  %s2054_s9 = inlined_call_operand.vmem [shape: f32[19,128], index: 9, kind: input, shape index: {}]   ;;  %s2055_s6 = inlined_call_operand.vmem [shape: f32[76,19], index: 6, kind: input, shape index: {}]   ;;  %s2056_s8 = inlined_call_operand.vmem [shape: f32[19,128], index: 8, kind: input, shape index: {}]   ;;  %s2057_s10 = inlined_call_operand.vmem [shape: f32[1,128], index: 10, kind: input, shape index: {}]   ;;  %s2058_s11 = inlined_call_operand.vmem [shape: f32[128,4], index: 11, kind: input, shape index: {}]   ;;  %s2059_s12 = inlined_call_operand.vmem [shape: f32[1,4], index: 12, kind: input, shape index: {}]   ;;  %s2060_s13 = inlined_call_operand.vmem [shape: f32[4,128], index: 13, kind: input, shape index: {}]   ;;  %s2061_s14 = inlined_call_operand.vmem [shape: f32[128,16], index: 14, kind: input, shape index: {}]   ;;  %s2062_s15 = inlined_call_operand.vmem [shape: f32[1,16], index: 15, kind: input, shape index: {}]   ;;  %s2063_s16 = inlined_call_operand.vmem [shape: f32[16,64], index: 16, kind: input, shape index: {}]   ;;  %s2064_s17 = inlined_call_operand.vmem [shape: f32[1,64], index: 17, kind: input, shape index: {}]   ;;  %s2065_s21 = inlined_call_operand.vmem [shape: f32[16,256], index: 21, kind: input, shape index: {}]   ;;  %s2066_s18 = inlined_call_operand.vmem [shape: f32[64,1], index: 18, kind: input, shape index: {}]   ;;  %s2067_s20 = inlined_call_operand.vmem [shape: f32[64,256], index: 20, kind: input, shape index: {}]   ;;  %s2068_s22 = inlined_call_operand.vmem [shape: f32[92,256], index: 22, kind: input, shape index: {}]   ;;  %s2069_s24 = inlined_call_operand.vmem [shape: f32[256,4], index: 24, kind: input, shape index: {}]   ;;  %s2070_s19 = inlined_call_operand.<no memory space> [shape: f32[1,1], index: 19, kind: input, shape index: {}]   ;;  %s2071_s23 = inlined_call_operand.vmem [shape: f32[1,256], index: 23, kind: input, shape index: {}]   ;;  %s2072_s25 = inlined_call_operand.vmem [shape: f32[1,4], index: 25, kind: input, shape index: {}]   ;;  %s2073_s26 = inlined_call_operand.vmem [shape: f32[4,92], index: 26, kind: input, shape index: {}]   ;;  %s2074_s27 = inlined_call_operand.vmem [shape: f32[92,3], index: 27, kind: input, shape index: {}]   ;;  %s2075_s28 = inlined_call_operand.vmem [shape: f32[16,4], index: 28, kind: output, shape index: {}]  }
   0x1   :  { %2086 = sst [smem:[#allocation3_spill]] %s2047_s1  ;;  %vm229_vm4 = vcmask 154624   ;;  %vm464_vm5 = vcmask 31744   ;;  %vm573_vm6 = vcmask 130048   ;;  %vm617_vm7 = vcmask 523264  }
   0x2   :  { %2087 = sst [smem:[#allocation4_spill]] %s2048_s3  ;;  %vm1082_vm12 = vcmask 23552  }
   0x3   :  { %2088 = sst [smem:[#allocation5_spill]] %s2049_s4 }
   0x4   :  { %2089 = sst [smem:[#allocation6_spill]] %s2050_s2 }
   0x5   :  { %2090 = sst [smem:[#allocation7_spill]] %s2051_s0 }
   0x6   :  { %2091 = sst [smem:[#allocation8_spill]] %s2052_s7 }
   0x7   :  { %2092 = sst [smem:[#allocation9_spill]] %s2053_s5 }
   0x8   :  { %2093 = sst [smem:[#allocation10_spill]] %s2054_s9 }
   0x9   :  { %2094 = sst [smem:[#allocation11_spill]] %s2055_s6 }
   0xa   :  { %2095 = sst [smem:[#allocation12_spill]] %s2056_s8 }
   0xb   :  { %2096 = sst [smem:[#allocation13_spill]] %s2057_s10 }
   0xc   :  { %2097 = sst [smem:[#allocation14_spill]] %s2058_s11 }
   0xd   :  { %2098 = sst [smem:[#allocation15_spill]] %s2059_s12 }
   0xe   :  { %s2099_s8 = sld [smem:[#allocation3_spill]] }
   0xf   :  { %s2100_s0 = sld [smem:[#allocation4_spill]] }
  0x10   :  { %s2101_s2 = sld [smem:[#allocation5_spill]] }
  0x11   :  { %s2102_s4 = sld [smem:[#allocation7_spill]] }
  0x12   :  { %s2103_s5 = sld [smem:[#allocation8_spill]] }
  0x13   :  { %s2104_s9 = sld [smem:[#allocation6_spill]] }
  0x14   :  { %v104_v0 = vld [vmem:[%s2099_s8 + $0x58] sm:$0xf]  ;;  %v103_v1 = vld [vmem:[%s2099_s8 + $0x50] sm:$0xff]  ;;  %v102_v4 = vld [vmem:[%s2099_s8 + $0x48] sm:$0xff]  ;;  %s2105_s12 = sld [smem:[#allocation9_spill]] }
  0x15   :  { %1091 = vmatpush.msk.msra.mxu0 %vm116_vm0, %v104_v0  ;;  %v156_v2 = vld [vmem:[%s2100_s0 + $0x58] sm:$0xf]  ;;  %v155_v3 = vld [vmem:[%s2100_s0 + $0x50] sm:$0xff]  ;;  %v154_v5 = vld [vmem:[%s2100_s0 + $0x48] sm:$0xff]  ;;  %s2106_s30 = sld [smem:[#allocation10_spill]] }
  0x16   :  { %1094 = vmatpush.msk.msra.mxu1 %vm116_vm0, %v156_v2  ;;  %v101_v6 = vld [vmem:[%s2099_s8 + $0x40] sm:$0xff]  ;;  %v100_v8 = vld [vmem:[%s2099_s8 + $0x38] sm:$0xff]  ;;  %v99_v10 = vld [vmem:[%s2099_s8 + $0x30] sm:$0xff]  ;;  %s2107_s6 = sld [smem:[#allocation11_spill]] }
  0x17   :  { %125 = vmatpush.msra.mxu0 %v103_v1  ;;  %v153_v7 = vld [vmem:[%s2100_s0 + $0x40] sm:$0xff]  ;;  %v152_v9 = vld [vmem:[%s2100_s0 + $0x38] sm:$0xff]  ;;  %v192_v11 = vld [vmem:[%s2101_s2 + $0x48] sm:$0xf]  ;;  %s2108_s11 = sld [smem:[#allocation12_spill]] }
  0x18   :  { %165 = vmatpush.msra.mxu1 %v155_v3  ;;  %v151_v12 = vld [vmem:[%s2100_s0 + $0x30] sm:$0xff]  ;;  %1097 = vmatpush.msk.msra.mxu2 %vm116_vm0, %v192_v11  ;;  %v191_v13 = vld [vmem:[%s2101_s2 + $0x40] sm:$0xff]  ;;  %v98_v14 = vld [vmem:[%s2099_s8 + $0x28] sm:$0xff]  ;;  %s2109_s7 = sld [smem:[#allocation14_spill]] }
  0x19   :  { %126 = vmatpush.msra.mxu0 %v102_v4  ;;  %v190_v15 = vld [vmem:[%s2101_s2 + $0x38] sm:$0xff]  ;;  %v150_v16 = vld [vmem:[%s2100_s0 + $0x28] sm:$0xff]  ;;  %v97_v17 = vld [vmem:[%s2099_s8 + $0x20] sm:$0xff]  ;;  %s2111_s1 = sld [smem:[#allocation15_spill]] }
  0x1a   :  { %166 = vmatpush.msra.mxu1 %v154_v5  ;;  %210 = vmatpush.msra.mxu2 %v191_v13  ;;  %v189_v18 = vld [vmem:[%s2101_s2 + $0x30] sm:$0xff]  ;;  %v149_v19 = vld [vmem:[%s2100_s0 + $0x20] sm:$0xff]  ;;  %v96_v20 = vld [vmem:[%s2099_s8 + $0x18] sm:$0xff] }
  0x1b   :  { %127 = vmatpush.msra.mxu0 %v101_v6  ;;  %v188_v21 = vld [vmem:[%s2101_s2 + $0x28] sm:$0xff]  ;;  %v148_v22 = vld [vmem:[%s2100_s0 + $0x18] sm:$0xff]  ;;  %v95_v23 = vld [vmem:[%s2099_s8 + $0x10] sm:$0xff] }
  0x1c   :  { %167 = vmatpush.msra.mxu1 %v153_v7  ;;  %211 = vmatpush.msra.mxu2 %v190_v15  ;;  %v187_v24 = vld [vmem:[%s2101_s2 + $0x20] sm:$0xff]  ;;  %v147_v25 = vld [vmem:[%s2100_s0 + $0x10] sm:$0xff]  ;;  %v94_v26 = vld [vmem:[%s2099_s8 + $0x8] sm:$0xff] }
  0x1d   :  { %128 = vmatpush.msra.mxu0 %v100_v8  ;;  %v146_v27 = vld [vmem:[%s2100_s0 + $0x8] sm:$0xff]  ;;  %v93_v28 = vld [vmem:[%s2099_s8] sm:$0xff]  ;;  %v316_v33 = vld [vmem:[%s2103_s5 + $0x38] sm:$0xff] }
  0x1e   :  { %168 = vmatpush.msra.mxu1 %v152_v9  ;;  %212 = vmatpush.msra.mxu2 %v189_v18  ;;  %v1417_v29 = vld [vmem:[%s2102_s4] sm:$0xff]  ;;  %v318_v31 = vld [vmem:[%s2103_s5 + $0x48] sm:$0xf]  ;;  %v315_v34 = vld [vmem:[%s2103_s5 + $0x30] sm:$0xff] }
  0x1f   :  { %129 = vmatpush.msra.mxu0 %v99_v10  ;;  %v145_v30 = vld [vmem:[%s2100_s0] sm:$0xff]  ;;  %v1442_v35 = vld [vmem:[%s2102_s4 + $0x8] sm:$0xff]  ;;  %v186_v38 = vld [vmem:[%s2101_s2 + $0x18] sm:$0xff] }
  0x20   :  { %169 = vmatpush.msra.mxu1 %v151_v12  ;;  %213 = vmatpush.msra.mxu2 %v188_v21  ;;  %v317_v32 = vld [vmem:[%s2103_s5 + $0x40] sm:$0xff]  ;;  %v314_v36 = vld [vmem:[%s2103_s5 + $0x28] sm:$0xff]  ;;  %v312_v39 = vld [vmem:[%s2103_s5 + $0x18] sm:$0xff] }
  0x21   :  { %130 = vmatpush.msra.mxu0 %v98_v14  ;;  %v313_v37 = vld [vmem:[%s2103_s5 + $0x20] sm:$0xff]  ;;  %v185_v40 = vld [vmem:[%s2101_s2 + $0x10] sm:$0xff]  ;;  %v184_v42 = vld [vmem:[%s2101_s2 + $0x8] sm:$0xff] }
  0x22   :  { %170 = vmatpush.msra.mxu1 %v150_v16  ;;  %214 = vmatpush.msra.mxu2 %v187_v24  ;;  %v311_v41 = vld [vmem:[%s2103_s5 + $0x10] sm:$0xff]  ;;  %v310_v43 = vld [vmem:[%s2103_s5 + $0x8] sm:$0xff]  ;;  %v183_v44 = vld [vmem:[%s2101_s2] sm:$0xff] }
  0x23   :  { %131 = vmatpush.msra.mxu0 %v97_v17  ;;  %v309_v45 = vld [vmem:[%s2103_s5] sm:$0xff]  ;;  %v228_v57 = vld [vmem:[%s2105_s12 + $0x10] sm:$0x7]  ;;  %v227_v59 = vld [vmem:[%s2105_s12 + $0x8] sm:$0xff] }
  0x24   :  { %171 = vmatpush.msra.mxu1 %v149_v19  ;;  %215 = vmatpush.msra.mxu2 %v186_v38  ;;  %v1145_v46 = vld [vmem:[%s2104_s9] ss:$0 sm:$0xff]  ;;  %v382_v58 = vld [vmem:[%s2106_s30 + $0x10] sm:$0x7]  ;;  %v381_v60 = vld [vmem:[%s2106_s30 + $0x8] sm:$0xff] }
  0x25   :  { %132 = vmatpush.msra.mxu0 %v96_v20  ;;  %1100 = vmatpush.msk.msra.mxu3 %vm236_vm3, %v228_v57  ;;  %v226_v61 = vld [vmem:[%s2105_s12] sm:$0xff]  ;;  %v276_v63 = vld [vmem:[%s2107_s6 + $0x48] sm:$0xf]  ;;  %v274_v1 = vld [vmem:[%s2107_s6 + $0x38] sm:$0xff] }
  0x26   :  { %172 = vmatpush.msra.mxu1 %v148_v22  ;;  %216 = vmatpush.msra.mxu2 %v185_v40  ;;  %v380_v62 = vld [vmem:[%s2106_s30] sm:$0xff]  ;;  %v273_v2 = vld [vmem:[%s2107_s6 + $0x30] sm:$0xff]  ;;  %v272_v3 = vld [vmem:[%s2107_s6 + $0x28] sm:$0xff] }
  0x27   :  { %133 = vmatpush.msra.mxu0 %v95_v23  ;;  %254 = vmatpush.msra.mxu3 %v227_v59  ;;  %v275_v0 = vld [vmem:[%s2107_s6 + $0x40] sm:$0xff]  ;;  %v270_v7 = vld [vmem:[%s2107_s6 + $0x18] sm:$0xff]  ;;  %v269_v8 = vld [vmem:[%s2107_s6 + $0x10] sm:$0xff] }
  0x28   :  { %173 = vmatpush.msra.mxu1 %v147_v25  ;;  %217 = vmatpush.msra.mxu2 %v184_v42  ;;  %v271_v6 = vld [vmem:[%s2107_s6 + $0x20] sm:$0xff]  ;;  %v268_v9 = vld [vmem:[%s2107_s6 + $0x8] sm:$0xff]  ;;  %v321_v11 = vld [vmem:[%s2108_s11 + $0x10] sm:$0x7] }
  0x29   :  { %134 = vmatpush.msra.mxu0 %v94_v26  ;;  %255 = vmatpush.msra.mxu3 %v226_v61  ;;  %v267_v10 = vld [vmem:[%s2107_s6] sm:$0xff]  ;;  %v320_v12 = vld [vmem:[%s2108_s11 + $0x8] sm:$0xff]  ;;  %v434_v20 = vld [vmem:[%s2109_s7 + $0x78] sm:$0xff] }
  0x2a   :  { %174 = vmatpush.msra.mxu1 %v146_v27  ;;  %218 = vmatpush.msra.mxu2 %v183_v44  ;;  %v319_v13 = vld [vmem:[%s2108_s11] sm:$0xff]  ;;  %v433_v21 = vld [vmem:[%s2109_s7 + $0x70] sm:$0xff]  ;;  %v432_v22 = vld [vmem:[%s2109_s7 + $0x68] sm:$0xff]  ;;  %s2110_s11 = sld [smem:[#allocation13_spill]] }
  0x2b   :  { %135 = vmatpush.msra.mxu0 %v93_v28  ;;  %1103 = vmatpush.msk.msrb.mxu3 %vm116_vm0, %v276_v63  ;;  %v431_v23 = vld [vmem:[%s2109_s7 + $0x60] sm:$0xff]  ;;  %v430_v24 = vld [vmem:[%s2109_s7 + $0x58] sm:$0xff]  ;;  %v429_v25 = vld [vmem:[%s2109_s7 + $0x50] sm:$0xff] }
  0x2c   :  { %1092 = vmatmul.msk.f32.vlgmr.msra.gmra.mxu0 %vm109_vm1, %v1417_v29  ;;  %175 = vmatpush.msra.mxu1 %v145_v30  ;;  %v428_v26 = vld [vmem:[%s2109_s7 + $0x48] sm:$0xff]  ;;  %v427_v27 = vld [vmem:[%s2109_s7 + $0x40] sm:$0xff]  ;;  %v426_v28 = vld [vmem:[%s2109_s7 + $0x38] sm:$0xff] }
  0x2d   :  { %1095 = vmatmul.msk.f32.vlgmr.msra.gmra.mxu1 %vm109_vm1, %v1417_v29  ;;  %1109 = vmatpush.msk.msrb.mxu0 %vm116_vm0, %v318_v31  ;;  %v425_v30 = vld [vmem:[%s2109_s7 + $0x30] sm:$0xff]  ;;  %v424_v31 = vld [vmem:[%s2109_s7 + $0x28] sm:$0xff] }
  0x2e   :  { %1112 = vmatpush.msk.msrb.mxu1 %vm236_vm3, %v382_v58  ;;  %293 = vmatpush.msrb.mxu3 %v275_v0  ;;  %v420_v38 = vld [vmem:[%s2109_s7 + $0x8] sm:$0xff]  ;;  %v487_v0 = vld [vmem:[%s2060_s13] sm:$0xf] }
  0x2f   :  { %364 = vmatpush.msrb.mxu0 %v317_v32  ;;  %1106 = vmatpush.msk.msrb.mxu2 %vm236_vm3, %v321_v11  ;;  %v537_v11 = vld [vmem:[%s2061_s14 + $0x78] sm:$0xff] }
  0x30   :  { %400 = vmatpush.msrb.mxu1 %v381_v60  ;;  %294 = vmatpush.msrb.mxu3 %v274_v1  ;;  %v1146_v44 = vld [vmem:[%s2110_s11] ss:$0 sm:$0xff] }
  0x31   :  { %365 = vmatpush.msrb.mxu0 %v316_v33  ;;  %345 = vmatpush.msrb.mxu2 %v320_v12  ;;  %v536_v12 = vld [vmem:[%s2061_s14 + $0x70] sm:$0xff] }
  0x32   :  { %401 = vmatpush.msrb.mxu1 %v380_v62  ;;  %295 = vmatpush.msrb.mxu3 %v273_v2 }
  0x33   :  { %366 = vmatpush.msrb.mxu0 %v315_v34  ;;  %346 = vmatpush.msrb.mxu2 %v319_v13  ;;  %v423_v34 = vld [vmem:[%s2109_s7 + $0x20] sm:$0xff]  ;;  %v535_v13 = vld [vmem:[%s2061_s14 + $0x68] sm:$0xff] }
  0x34   :  { %1093 = vmatmul.msk.f32.gmra.mxu0 %vm109_vm1, %v1442_v35  ;;  %296 = vmatpush.msrb.mxu3 %v272_v3 }
  0x35   :  { %1096 = vmatmul.msk.f32.gmra.mxu1 %vm109_vm1, %v1442_v35  ;;  %367 = vmatpush.msrb.mxu0 %v314_v36  ;;  %v422_v36 = vld [vmem:[%s2109_s7 + $0x18] sm:$0xff] }
  0x36   :  { %297 = vmatpush.msrb.mxu3 %v271_v6  ;;  %542 = vmatpush.msra.mxu1 %v537_v11  ;;  %v800_v11 = vld [vmem:[%s2068_s22 + $0x28] sm:$0xff] }
  0x37   :  { %368 = vmatpush.msrb.mxu0 %v313_v37  ;;  %v421_v37 = vld [vmem:[%s2109_s7 + $0x10] sm:$0xff] }
  0x38   :  { %298 = vmatpush.msrb.mxu3 %v270_v7  ;;  %543 = vmatpush.msra.mxu1 %v536_v12  ;;  %v605_v12 = vld [vmem:[%s2066_s18] sm:$0xff] }
  0x39   :  { %369 = vmatpush.msrb.mxu0 %v312_v39  ;;  %v419_v39 = vld [vmem:[%s2109_s7] sm:$0xff] }
  0x3a   :  { %299 = vmatpush.msrb.mxu3 %v269_v8  ;;  %544 = vmatpush.msra.mxu1 %v535_v13  ;;  %v684_v13 = vld [vmem:[%s2067_s20 + $0x8] sm:$0xff] }
  0x3b   :  { %370 = vmatpush.msrb.mxu0 %v311_v41 }
  0x3c   :  { %300 = vmatpush.msrb.mxu3 %v268_v9 }
  0x3d   :  { %371 = vmatpush.msrb.mxu0 %v310_v43 }
  0x3e   :  { %301 = vmatpush.msrb.mxu3 %v267_v10 }
  0x3f   :  { %372 = vmatpush.msrb.mxu0 %v309_v45 }
  0xa9   :  { %v137_v47 = vpop.f32.mrf.mxu0 }
  0xaa   :  { %v138_v48 = vadd.f32 %v1145_v46, %v137_v47  ;;  %v177_v49 = vpop.f32.mrf.mxu1 }
  0xac   :  { %v143_v50 = vmax.f32 %v138_v48, 0.0 }
  0xae   :  { %v178_v51 = vadd.f32 %v177_v49, %v143_v50 }
  0xb0   :  { %1098 = vmatmul.msk.f32.vlgmr.msra.gmra.mxu2 %vm193_vm2, %v178_v51  ;;  %1110 = vmatmul.msk.f32.vlgmr.msrb.gmra.mxu0 %vm193_vm2, %v178_v51 }
  0xb1   :  { %v140_v52 = vpop.f32.mrf.mxu0  ;;  %1115 = vmatpush.msk.msra.mxu2 %vm116_vm0, %v487_v0  ;;  %v812_v0 = vld [vmem:[%s2068_s22 + $0x88] sm:$0xff] }
  0xb2   :  { %v141_v53 = vadd.f32 %v1145_v46, %v140_v52  ;;  %v180_v54 = vpop.f32.mrf.mxu1 }
  0xb4   :  { %v144_v55 = vmax.f32 %v141_v53, 0.0 }
  0xb6   :  { %v181_v56 = vadd.f32 %v180_v54, %v144_v55  ;;  %v1147_v55 = vld [vmem:[%s2111_s1] ss:$0 sm:$0xff] }
  0xb8   :  { %1099 = vmatmul.msk.f32.gmra.mxu2 %vm193_vm2, %v181_v56  ;;  %1111 = vmatmul.msk.f32.gmra.mxu0 %vm193_vm2, %v181_v56 }
 0x12d   :  { %v374_v40 = vpop.f32.mrf.mxu0 }
 0x133   :  { %v220_v4 = vpop.f32.mrf.mxu2 }
 0x134   :  { %1101 = vmatmul.msk.f32.vlgmr.msra.gmra.mxu3 %vm229_vm4, %v220_v4  ;;  %1113 = vmatmul.msk.f32.vlgmr.msrb.gmra.mxu1 %vm229_vm4, %v220_v4 }
 0x135   :  { %439 = vmatpush.msra.mxu3 %v434_v20  ;;  %v377_v48 = vpop.f32.mrf.mxu0  ;;  %v529_v20 = vld [vmem:[%s2061_s14 + $0x38] sm:$0xff] }
 0x137   :  { %440 = vmatpush.msra.mxu3 %v433_v21  ;;  %v528_v21 = vld [vmem:[%s2061_s14 + $0x30] sm:$0xff] }
 0x139   :  { %441 = vmatpush.msra.mxu3 %v432_v22  ;;  %v527_v22 = vld [vmem:[%s2061_s14 + $0x28] sm:$0xff] }
 0x13b   :  { %v223_v5 = vpop.f32.mrf.mxu2  ;;  %442 = vmatpush.msra.mxu3 %v431_v23  ;;  %v526_v23 = vld [vmem:[%s2061_s14 + $0x20] sm:$0xff] }
 0x13c   :  { %1102 = vmatmul.msk.f32.gmra.mxu3 %vm229_vm4, %v223_v5  ;;  %1114 = vmatmul.msk.f32.gmra.mxu1 %vm229_vm4, %v223_v5 }
 0x13d   :  { %443 = vmatpush.msra.mxu3 %v430_v24 }
 0x13f   :  { %444 = vmatpush.msra.mxu3 %v429_v25 }
 0x141   :  { %445 = vmatpush.msra.mxu3 %v428_v26 }
 0x143   :  { %446 = vmatpush.msra.mxu3 %v427_v27  ;;  %v525_v27 = vld [vmem:[%s2061_s14 + $0x18] sm:$0xff] }
 0x145   :  { %447 = vmatpush.msra.mxu3 %v426_v28  ;;  %v524_v28 = vld [vmem:[%s2061_s14 + $0x10] sm:$0xff] }
 0x147   :  { %448 = vmatpush.msra.mxu3 %v425_v30 }
 0x149   :  { %449 = vmatpush.msra.mxu3 %v424_v31 }
 0x14b   :  { %450 = vmatpush.msra.mxu3 %v423_v34  ;;  %v568_v34 = vld [vmem:[%s2063_s16 + $0x8] sm:$0xff] }
 0x14c   :  { %594 = vmatpush.msra.mxu0 %v568_v34 }
 0x14d   :  { %451 = vmatpush.msra.mxu3 %v422_v36 }
 0x14f   :  { %452 = vmatpush.msra.mxu3 %v421_v37 }
 0x151   :  { %453 = vmatpush.msra.mxu3 %v420_v38 }
 0x153   :  { %454 = vmatpush.msra.mxu3 %v419_v39 }
 0x1b1   :  { %v403_v41 = vpop.f32.mrf.mxu1 }
 0x1b7   :  { %v257_v14 = vpop.f32.mrf.mxu3 }
 0x1b8   :  { %v263_v15 = vsub.f32 %v178_v51, %v257_v14  ;;  %v534_v14 = vld [vmem:[%s2061_s14 + $0x60] sm:$0xff] }
 0x1b9   :  { %v406_v51 = vpop.f32.mrf.mxu1  ;;  %545 = vmatpush.msra.mxu1 %v534_v14  ;;  %v798_v14 = vld [vmem:[%s2068_s22 + $0x18] sm:$0xff] }
 0x1ba   :  { %v265_v16 = vmul.f32 %v263_v15, %v263_v15  ;;  %v533_v15 = vld [vmem:[%s2061_s14 + $0x58] sm:$0xff] }
 0x1bb   :  { %546 = vmatpush.msra.mxu1 %v533_v15  ;;  %v817_v15 = vld [vmem:[%s2068_s22 + $0xb0] sm:$0xf] }
 0x1bc   :  { %1104 = vmatmul.msk.f32.vlgmr.msrb.gmra.mxu3 %vm193_vm2, %v265_v16  ;;  %v532_v16 = vld [vmem:[%s2061_s14 + $0x50] sm:$0xff] }
 0x1bd   :  { %547 = vmatpush.msra.mxu1 %v532_v16  ;;  %1142 = vmatpush.msrb.mxu3 %v568_v34  ;;  %v796_v16 = vld [vmem:[%s2068_s22 + $0x8] sm:$0xff]  ;;  %v683_v34 = vld [vmem:[%s2067_s20] sm:$0xff] }
 0x1bf   :  { %v260_v17 = vpop.f32.mrf.mxu3 }
 0x1c0   :  { %v264_v18 = vsub.f32 %v181_v56, %v260_v17  ;;  %v531_v17 = vld [vmem:[%s2061_s14 + $0x48] sm:$0xff] }
 0x1c1   :  { %548 = vmatpush.msra.mxu1 %v531_v17  ;;  %v815_v17 = vld [vmem:[%s2068_s22 + $0xa0] sm:$0xff] }
 0x1c2   :  { %v266_v19 = vmul.f32 %v264_v18, %v264_v18  ;;  %v530_v18 = vld [vmem:[%s2061_s14 + $0x40] sm:$0xff] }
 0x1c3   :  { %549 = vmatpush.msra.mxu1 %v530_v18  ;;  %v813_v18 = vld [vmem:[%s2068_s22 + $0x90] sm:$0xff] }
 0x1c4   :  { %1105 = vmatmul.msk.f32.gmra.mxu3 %vm193_vm2, %v266_v19 }
 0x1c5   :  { %550 = vmatpush.msra.mxu1 %v529_v20  ;;  %v811_v20 = vld [vmem:[%s2068_s22 + $0x80] sm:$0xff] }
 0x1c7   :  { %551 = vmatpush.msra.mxu1 %v528_v21  ;;  %v695_v21 = vld [vmem:[%s2067_s20 + $0x60] sm:$0xff] }
 0x1c9   :  { %552 = vmatpush.msra.mxu1 %v527_v22  ;;  %v809_v22 = vld [vmem:[%s2068_s22 + $0x70] sm:$0xff] }
 0x1cb   :  { %553 = vmatpush.msra.mxu1 %v526_v23  ;;  %v693_v23 = vld [vmem:[%s2067_s20 + $0x50] sm:$0xff] }
 0x1cd   :  { %554 = vmatpush.msra.mxu1 %v525_v27  ;;  %v689_v27 = vld [vmem:[%s2067_s20 + $0x30] sm:$0xff] }
 0x1cf   :  { %555 = vmatpush.msra.mxu1 %v524_v28  ;;  %v803_v28 = vld [vmem:[%s2068_s22 + $0x40] sm:$0xff] }
 0x23f   :  { %v303_v32 = vpop.f32.mrf.mxu3 }
 0x240   :  { %1107 = vmatmul.msk.f32.vlgmr.msrb.gmra.mxu2 %vm229_vm4, %v303_v32  ;;  %v523_v32 = vld [vmem:[%s2061_s14 + $0x8] sm:$0xff] }
 0x241   :  { %556 = vmatpush.msra.mxu1 %v523_v32  ;;  %v685_v32 = vld [vmem:[%s2067_s20 + $0x10] sm:$0xff] }
 0x247   :  { %v306_v33 = vpop.f32.mrf.mxu3 }
 0x248   :  { %1108 = vmatmul.msk.f32.gmra.mxu2 %vm229_vm4, %v306_v33  ;;  %v522_v33 = vld [vmem:[%s2061_s14] sm:$0xff] }
 0x249   :  { %557 = vmatpush.msra.mxu1 %v522_v33  ;;  %v799_v33 = vld [vmem:[%s2068_s22 + $0x20] sm:$0xff] }
 0x2c3   :  { %v348_v42 = vpop.f32.mrf.mxu2 }
 0x2c4   :  { %v375_v43 = vadd.f32 %v374_v40, %v348_v42  ;;  %v567_v40 = vld [vmem:[%s2063_s16] sm:$0xff]  ;;  %v700_v42 = vld [vmem:[%s2065_s21 + $0x8] sm:$0xff] }
 0x2c5   :  { %595 = vmatpush.msra.mxu0 %v567_v40  ;;  %1143 = vmatpush.msrb.mxu3 %v567_v40 }
 0x2c6   :  { %v409_v45 = vadd.f32 %v403_v41, %v375_v43  ;;  %v702_v41 = vld [vmem:[%s2065_s21 + $0x18] sm:$0xff]  ;;  %v701_v43 = vld [vmem:[%s2065_s21 + $0x10] sm:$0xff] }
 0x2c7   :  { %740 = vmatpush.msrb.mxu0 %v702_v41 }
 0x2c8   :  { %v1605_v46 = vadd.f32 %v1146_v44, %v409_v45  ;;  %v1148_v45 = vld [vmem:[%s2062_s15] ss:$0 sm:$0xff] }
 0x2c9   :  { %741 = vmatpush.msrb.mxu0 %v700_v42  ;;  %v920_v42 = vld [vmem:[%s2069_s24 + $0xf8] sm:$0xff] }
 0x2ca   :  { %v417_v47 = vmax.f32 %v1605_v46, 0.0  ;;  %v612_v46 = vld [vmem:[%s2066_s18 + $0x38] sm:$0xff] }
 0x2cb   :  { %v351_v49 = vpop.f32.mrf.mxu2  ;;  %632 = vmatpush.msrb.mxu2 %v612_v46  ;;  %v915_v46 = vld [vmem:[%s2069_s24 + $0xd0] sm:$0xff] }
 0x2cc   :  { %v378_v50 = vadd.f32 %v377_v48, %v351_v49  ;;  %455 = vmatmul.f32.vlgmr.msra.gmra.mxu3 %v417_v47  ;;  %v611_v48 = vld [vmem:[%s2066_s18 + $0x30] sm:$0xff]  ;;  %v696_v49 = vld [vmem:[%s2067_s20 + $0x68] sm:$0xff] }
 0x2cd   :  { %717 = vmatpush.msra.mxu3 %v701_v43  ;;  %633 = vmatpush.msrb.mxu2 %v611_v48  ;;  %v919_v43 = vld [vmem:[%s2069_s24 + $0xf0] sm:$0xff] }
 0x2ce   :  { %v410_v52 = vadd.f32 %v406_v51, %v378_v50  ;;  %v610_v51 = vld [vmem:[%s2066_s18 + $0x28] sm:$0xff] }
 0x2cf   :  { %634 = vmatpush.msrb.mxu2 %v610_v51  ;;  %v912_v51 = vld [vmem:[%s2069_s24 + $0xb8] sm:$0xff] }
 0x2d0   :  { %v1610_v53 = vadd.f32 %v1146_v44, %v410_v52  ;;  %v699_v44 = vld [vmem:[%s2065_s21] sm:$0xff]  ;;  %v694_v52 = vld [vmem:[%s2067_s20 + $0x58] sm:$0xff] }
 0x2d1   :  { %718 = vmatpush.msra.mxu3 %v699_v44  ;;  %v917_v44 = vld [vmem:[%s2069_s24 + $0xe0] sm:$0xff] }
 0x2d2   :  { %v418_v54 = vmax.f32 %v1610_v53, 0.0 }
 0x2d4   :  { %458 = vmatmul.f32.gmra.mxu3 %v418_v54 }
 0x34f   :  { %v456_v56 = vpop.f32.mrf.mxu3 }
 0x350   :  { %v457_v57 = vadd.f32 %v1147_v55, %v456_v56  ;;  %v818_v56 = vld [vmem:[%s2068_s22 + $0xb8] sm:$0xf] }
 0x352   :  { %v462_v58 = vmax.f32 %v457_v57, 0.0  ;;  %v692_v57 = vld [vmem:[%s2067_s20 + $0x48] sm:$0xff] }
 0x354   :  { %v465_v59 = vsel %vm464_vm5, %v462_v58, -inf }
 0x355   :  { %466 = vmax.xlane.f32.xlu0 %v465_v59  ;;  %v816_v59 = vld [vmem:[%s2068_s22 + $0xa8] sm:$0xff] }
 0x357   :  { %v459_v60 = vpop.f32.mrf.mxu3 }
 0x358   :  { %v460_v61 = vadd.f32 %v1147_v55, %v459_v60  ;;  %v690_v60 = vld [vmem:[%s2067_s20 + $0x38] sm:$0xff] }
 0x35a   :  { %v463_v62 = vmax.f32 %v460_v61, 0.0  ;;  %v814_v61 = vld [vmem:[%s2068_s22 + $0x98] sm:$0xff] }
 0x35c   :  { %v468_v63 = vsel %vm464_vm5, %v463_v62, -inf }
 0x35d   :  { %469 = vmax.xlane.f32.xlu0 %v468_v63 }
 0x3c8   :  { %v467_v1 = vpop.xlane.xlu0 %466 }
 0x3c9   :  { %v471_v2 = vsub.f32 %v462_v58, %v467_v1  ;;  %v608_v58 = vld [vmem:[%s2066_s18 + $0x18] sm:$0xff] }
 0x3cb   :  { %v473_v3 = vmul.f32 1.442695, %v471_v2  ;;  %v810_v2 = vld [vmem:[%s2068_s22 + $0x78] sm:$0xff] }
 0x3cd   :  { %1152 = vpow2.f32 %v473_v3  ;;  %v808_v3 = vld [vmem:[%s2068_s22 + $0x68] sm:$0xff] }
 0x3d0   :  { %v470_v4 = vpop.xlane.xlu0 %469 }
 0x3d1   :  { %v472_v5 = vsub.f32 %v463_v62, %v470_v4  ;;  %v806_v4 = vld [vmem:[%s2068_s22 + $0x58] sm:$0xff] }
 0x3d3   :  { %v1153_v6 = vpop.eup %1152  ;;  %v475_v7 = vmul.f32 1.442695, %v472_v5  ;;  %v804_v5 = vld [vmem:[%s2068_s22 + $0x48] sm:$0xff] }
 0x3d4   :  { %v477_v8 = vsel %vm464_vm5, %v1153_v6, 0.0 }
 0x3d5   :  { %1154 = vpow2.f32 %v475_v7  ;;  %478 = vadd.xlane.f32.xlu1 %v477_v8  ;;  %v688_v7 = vld [vmem:[%s2067_s20 + $0x28] sm:$0xff]  ;;  %v802_v8 = vld [vmem:[%s2068_s22 + $0x38] sm:$0xff] }
 0x3db   :  { %v1155_v9 = vpop.eup %1154 }
 0x3dc   :  { %v480_v10 = vsel %vm464_vm5, %v1155_v9, 0.0 }
 0x3dd   :  { %481 = vadd.xlane.f32.xlu1 %v480_v10  ;;  %v686_v10 = vld [vmem:[%s2067_s20 + $0x18] sm:$0xff] }
 0x448   :  { %v479_v19 = vpop.xlane.xlu1 %478 }
 0x449   :  { %1156 = vrcp.f32 %v479_v19  ;;  %v697_v19 = vld [vmem:[%s2067_s20 + $0x70] sm:$0xff] }
 0x44f   :  { %v1157_v24 = vpop.eup %1156 }
 0x450   :  { %v485_v25 = vmul.f32 %v1157_v24, %v1153_v6  ;;  %v482_v26 = vpop.xlane.xlu1 %481  ;;  %v607_v6 = vld [vmem:[%s2066_s18 + $0x10] sm:$0xff]  ;;  %v807_v24 = vld [vmem:[%s2068_s22 + $0x60] sm:$0xff] }
 0x451   :  { %1158 = vrcp.f32 %v482_v26  ;;  %v805_v26 = vld [vmem:[%s2068_s22 + $0x50] sm:$0xff] }
 0x452   :  { %1116 = vmatmul.msk.f32.vlgmr.msra.gmra.mxu2 %vm464_vm5, %v485_v25  ;;  %v691_v25 = vld [vmem:[%s2067_s20 + $0x40] sm:$0xff] }
 0x457   :  { %v1159_v30 = vpop.eup %1158 }
 0x458   :  { %v486_v31 = vmul.f32 %v1159_v30, %v1155_v9  ;;  %v606_v9 = vld [vmem:[%s2066_s18 + $0x8] sm:$0xff]  ;;  %v687_v30 = vld [vmem:[%s2067_s20 + $0x20] sm:$0xff] }
 0x45a   :  { %1117 = vmatmul.msk.f32.gmra.mxu2 %vm464_vm5, %v486_v31  ;;  %v801_v31 = vld [vmem:[%s2068_s22 + $0x30] sm:$0xff] }
 0x4d5   :  { %v514_v36 = vpop.f32.mrf.mxu2 }
 0x4d6   :  { %v520_v37 = vmul.f32 %v514_v36, %v417_v47  ;;  %v698_v47 = vld [vmem:[%s2067_s20 + $0x78] sm:$0xff]  ;;  %v797_v36 = vld [vmem:[%s2068_s22 + $0x10] sm:$0xff] }
 0x4d7   :  { %780 = vmatpush.msrb.mxu1 %v698_v47 }
 0x4d8   :  { %558 = vmatmul.f32.vlgmr.msra.gmra.mxu1 %v520_v37  ;;  %v795_v37 = vld [vmem:[%s2068_s22] sm:$0xff] }
 0x4d9   :  { %781 = vmatpush.msrb.mxu1 %v696_v49  ;;  %v913_v49 = vld [vmem:[%s2069_s24 + $0xc0] sm:$0xff] }
 0x4db   :  { %782 = vmatpush.msrb.mxu1 %v694_v52  ;;  %v911_v52 = vld [vmem:[%s2069_s24 + $0xb0] sm:$0xff] }
 0x4dd   :  { %v517_v38 = vpop.f32.mrf.mxu2  ;;  %783 = vmatpush.msrb.mxu1 %v692_v57  ;;  %v907_v57 = vld [vmem:[%s2069_s24 + $0x90] sm:$0xff] }
 0x4de   :  { %v521_v39 = vmul.f32 %v517_v38, %v418_v54  ;;  %v609_v54 = vld [vmem:[%s2066_s18 + $0x20] sm:$0xff] }
 0x4df   :  { %635 = vmatpush.msrb.mxu2 %v609_v54  ;;  %784 = vmatpush.msrb.mxu1 %v690_v60  ;;  %v1149_v38 = vld [vmem:[%s2064_s17] ss:$0 sm:$0xff]  ;;  %v33_v54 = vstv %s2070_s19  ;;  %v903_v60 = vld [vmem:[%s2069_s24 + $0x70] sm:$0xff] }
 0x4e0   :  { %561 = vmatmul.f32.gmra.mxu1 %v521_v39  ;;  %34 = vst [vmem:[#allocation2] sm:$0x1] %v33_v54 }
 0x4e1   :  { %636 = vmatpush.msrb.mxu2 %v608_v58  ;;  %785 = vmatpush.msrb.mxu1 %v688_v7  ;;  %v904_v58 = vld [vmem:[%s2069_s24 + $0x78] sm:$0xff] }
 0x4e3   :  { %637 = vmatpush.msrb.mxu2 %v607_v6  ;;  %786 = vmatpush.msrb.mxu1 %v686_v10  ;;  %v895_v6 = vld [vmem:[%s2069_s24 + $0x30] sm:$0xff]  ;;  %v892_v10 = vld [vmem:[%s2069_s24 + $0x18] sm:$0xff] }
 0x4e5   :  { %638 = vmatpush.msrb.mxu2 %v606_v9  ;;  %787 = vmatpush.msrb.mxu1 %v684_v13  ;;  %v893_v9 = vld [vmem:[%s2069_s24 + $0x20] sm:$0xff] }
 0x4e7   :  { %639 = vmatpush.msrb.mxu2 %v605_v12  ;;  %948 = vmatpush.msra.mxu1 %v920_v42  ;;  %v891_v12 = vld [vmem:[%s2069_s24 + $0x10] sm:$0xff] }
 0x4e9   :  { %757 = vmatpush.msra.mxu2 %v697_v19  ;;  %949 = vmatpush.msra.mxu1 %v919_v43  ;;  %v889_v19 = vld [vmem:[%s2069_s24] sm:$0xff] }
 0x4eb   :  { %758 = vmatpush.msra.mxu2 %v695_v21 }
 0x4ed   :  { %759 = vmatpush.msra.mxu2 %v693_v23 }
 0x4ef   :  { %760 = vmatpush.msra.mxu2 %v691_v25 }
 0x4f1   :  { %761 = vmatpush.msra.mxu2 %v689_v27 }
 0x4f3   :  { %762 = vmatpush.msra.mxu2 %v687_v30  ;;  %v1150_v30 = vld [vmem:[#allocation2] ss:$0 sm:$0xff] }
 0x4f5   :  { %763 = vmatpush.msra.mxu2 %v685_v32 }
 0x4f7   :  { %764 = vmatpush.msra.mxu2 %v683_v34 }
 0x555   :  { %v559_v50 = vpop.f32.mrf.mxu1 }
 0x556   :  { %v560_v53 = vadd.f32 %v1148_v45, %v559_v50 }
 0x558   :  { %v565_v55 = vmax.f32 %v560_v53, 0.0  ;;  %v910_v53 = vld [vmem:[%s2069_s24 + $0xa8] sm:$0xff] }
 0x55a   :  { %1118 = vmatmul.msk.f32.vlgmr.msra.gmra.mxu0 %vm573_vm6, %v565_v55 }
 0x55b   :  { %1133 = vmatpush.msk.msra.mxu0 %vm116_vm0, %v818_v56  ;;  %v908_v56 = vld [vmem:[%s2069_s24 + $0x98] sm:$0xff] }
 0x55d   :  { %v562_v62 = vpop.f32.mrf.mxu1  ;;  %853 = vmatpush.msra.mxu0 %v816_v59  ;;  %v906_v59 = vld [vmem:[%s2069_s24 + $0x88] sm:$0xff] }
 0x55e   :  { %v563_v63 = vadd.f32 %v1148_v45, %v562_v62  ;;  %v916_v45 = vld [vmem:[%s2069_s24 + $0xd8] sm:$0xff]  ;;  %v902_v62 = vld [vmem:[%s2069_s24 + $0x68] sm:$0xff] }
 0x55f   :  { %854 = vmatpush.msra.mxu0 %v814_v61  ;;  %v905_v61 = vld [vmem:[%s2069_s24 + $0x80] sm:$0xff] }
 0x560   :  { %v566_v1 = vmax.f32 %v563_v63, 0.0  ;;  %v901_v63 = vld [vmem:[%s2069_s24 + $0x60] sm:$0xff] }
 0x561   :  { %855 = vmatpush.msra.mxu0 %v812_v0  ;;  %v900_v0 = vld [vmem:[%s2069_s24 + $0x58] sm:$0xff] }
 0x562   :  { %1119 = vmatmul.msk.f32.vlgmr.msrb.gmra.mxu3 %vm573_vm6, %v566_v1  ;;  %1124 = vmatmul.msk.f32.vlgmr.msrb.gmra.mxu0 %vm573_vm6, %v565_v55 }
 0x563   :  { %856 = vmatpush.msra.mxu0 %v810_v2  ;;  %1130 = vmatpush.msk.msrb.mxu3 %vm116_vm0, %v817_v15  ;;  %v899_v2 = vld [vmem:[%s2069_s24 + $0x50] sm:$0xff] }
 0x565   :  { %857 = vmatpush.msra.mxu0 %v808_v3  ;;  %830 = vmatpush.msrb.mxu3 %v815_v17  ;;  %v898_v3 = vld [vmem:[%s2069_s24 + $0x48] sm:$0xff] }
 0x566   :  { %v890_v17 = vld [vmem:[%s2069_s24 + $0x8] sm:$0xff] }
 0x567   :  { %858 = vmatpush.msra.mxu0 %v806_v4  ;;  %831 = vmatpush.msrb.mxu3 %v813_v18  ;;  %v897_v4 = vld [vmem:[%s2069_s24 + $0x40] sm:$0xff] }
 0x569   :  { %859 = vmatpush.msra.mxu0 %v804_v5  ;;  %832 = vmatpush.msrb.mxu3 %v811_v20  ;;  %v896_v5 = vld [vmem:[%s2069_s24 + $0x38] sm:$0xff] }
 0x56a   :  { %1122 = vmatmul.msk.f32.vlgmr.msra.gmra.mxu3 %vm573_vm6, %v565_v55  ;;  %1125 = vmatmul.msk.f32.gmra.mxu0 %vm573_vm6, %v566_v1  ;;  %v909_v55 = vld [vmem:[%s2069_s24 + $0xa0] sm:$0xff] }
 0x56b   :  { %860 = vmatpush.msra.mxu0 %v802_v8  ;;  %833 = vmatpush.msrb.mxu3 %v809_v22  ;;  %v894_v8 = vld [vmem:[%s2069_s24 + $0x28] sm:$0xff] }
 0x56d   :  { %861 = vmatpush.msra.mxu0 %v800_v11  ;;  %834 = vmatpush.msrb.mxu3 %v807_v24  ;;  %v875_v11 = vld [vmem:[%s2071_s23] sm:$0x3] }
 0x56f   :  { %862 = vmatpush.msra.mxu0 %v798_v14  ;;  %835 = vmatpush.msrb.mxu3 %v805_v26 }
 0x571   :  { %863 = vmatpush.msra.mxu0 %v796_v16  ;;  %836 = vmatpush.msrb.mxu3 %v803_v28  ;;  %v878_v16 = vperm.slane %v875_v11, 1 }
 0x572   :  { %1123 = vmatmul.msk.f32.gmra.mxu3 %vm573_vm6, %v566_v1  ;;  %1134 = vmatmul.msk.f32.vlgmr.msra.gmra.mxu0 %vm109_vm1, %v1417_v29 }
 0x573   :  { %837 = vmatpush.msrb.mxu3 %v801_v31 }
 0x575   :  { %838 = vmatpush.msrb.mxu3 %v799_v33 }
 0x577   :  { %839 = vmatpush.msrb.mxu3 %v797_v36 }
 0x579   :  { %840 = vmatpush.msrb.mxu3 %v795_v37 }
 0x57a   :  { %1135 = vmatmul.msk.f32.gmra.mxu0 %vm109_vm1, %v1442_v35  ;;  %1131 = vmatmul.msk.f32.vlgmr.msrb.gmra.mxu3 %vm109_vm1, %v1417_v29  ;;  %v918_v29 = vld [vmem:[%s2069_s24 + $0xe8] sm:$0xff] }
 0x57b   :  { %950 = vmatpush.msra.mxu1 %v918_v29 }
 0x57d   :  { %951 = vmatpush.msra.mxu1 %v917_v44 }
 0x57f   :  { %952 = vmatpush.msra.mxu1 %v916_v45 }
 0x581   :  { %953 = vmatpush.msra.mxu1 %v915_v46 }
 0x582   :  { %1132 = vmatmul.msk.f32.gmra.mxu3 %vm109_vm1, %v1442_v35  ;;  %v914_v35 = vld [vmem:[%s2069_s24 + $0xc8] sm:$0xff] }
 0x583   :  { %954 = vmatpush.msra.mxu1 %v914_v35 }
 0x585   :  { %955 = vmatpush.msra.mxu1 %v913_v49  ;;  %v1151_v49 = vld [vmem:[%s2072_s25] ss:$0 sm:$0xff]  ;;  %s1178_s25 = smov 3  }
 0x587   :  { %956 = vmatpush.msra.mxu1 %v912_v51 }
 0x589   :  { %957 = vmatpush.msra.mxu1 %v911_v52 }
 0x58b   :  { %958 = vmatpush.msra.mxu1 %v910_v53 }
 0x58d   :  { %959 = vmatpush.msra.mxu1 %v909_v55 }
 0x58f   :  { %960 = vmatpush.msra.mxu1 %v908_v56 }
 0x591   :  { %961 = vmatpush.msra.mxu1 %v907_v57 }
 0x593   :  { %962 = vmatpush.msra.mxu1 %v906_v59 }
 0x595   :  { %963 = vmatpush.msra.mxu1 %v905_v61 }
 0x5d7   :  { %v597_v39 = vpop.f32.mrf.mxu0 }
 0x5d8   :  { %v598_v40 = vadd.f32 %v1149_v38, %v597_v39  ;;  %v877_v39 = vperm.slane %v875_v11, 0 }
 0x5da   :  { %v603_v41 = vmax.f32 %v598_v40, 0.0 }
 0x5dc   :  { %1120 = vmatmul.msk.f32.vlgmr.msrb.gmra.mxu2 %vm617_vm7, %v603_v41  ;;  %1128 = vmatmul.msk.f32.vlgmr.msrb.gmra.mxu1 %vm617_vm7, %v603_v41 }
 0x5dd   :  { %925 = vmatpush.msrb.mxu2 %v904_v58 }
 0x5df   :  { %926 = vmatpush.msrb.mxu2 %v903_v60  ;;  %v743_v1 = vpop.f32.mrf.mxu0 }
 0x5e1   :  { %927 = vmatpush.msrb.mxu2 %v902_v62 }
 0x5e3   :  { %928 = vmatpush.msrb.mxu2 %v901_v63 }
 0x5e5   :  { %v600_v47 = vpop.f32.mrf.mxu3  ;;  %929 = vmatpush.msrb.mxu2 %v900_v0 }
 0x5e6   :  { %v601_v48 = vadd.f32 %v1149_v38, %v600_v47 }
 0x5e7   :  { %930 = vmatpush.msrb.mxu2 %v899_v2  ;;  %v746_v7 = vpop.f32.mrf.mxu0 }
 0x5e8   :  { %v604_v50 = vmax.f32 %v601_v48, 0.0 }
 0x5e9   :  { %931 = vmatpush.msrb.mxu2 %v898_v3 }
 0x5ea   :  { %1121 = vmatmul.msk.f32.gmra.mxu2 %vm617_vm7, %v604_v50  ;;  %1129 = vmatmul.msk.f32.gmra.mxu1 %vm617_vm7, %v604_v50 }
 0x5eb   :  { %932 = vmatpush.msrb.mxu2 %v897_v4 }
 0x5ed   :  { %933 = vmatpush.msrb.mxu2 %v896_v5  ;;  %v720_v22 = vpop.f32.mrf.mxu3 }
 0x5ef   :  { %934 = vmatpush.msrb.mxu2 %v895_v6  ;;  %v865_v14 = vpop.f32.mrf.mxu0 }
 0x5f1   :  { %935 = vmatpush.msrb.mxu2 %v894_v8 }
 0x5f2   :  { %1126 = vmatmul.msk.f32.vlgmr.msra.gmra.mxu2 %vm617_vm7, %v603_v41 }
 0x5f3   :  { %936 = vmatpush.msrb.mxu2 %v893_v9 }
 0x5f5   :  { %937 = vmatpush.msrb.mxu2 %v892_v10  ;;  %v723_v28 = vpop.f32.mrf.mxu3 }
 0x5f7   :  { %938 = vmatpush.msrb.mxu2 %v891_v12  ;;  %v868_v25 = vpop.f32.mrf.mxu0 }
 0x5f9   :  { %939 = vmatpush.msrb.mxu2 %v890_v17  ;;  %v995_v17 = vld [vmem:[%s2073_s26] sm:$0xf] }
 0x5fa   :  { %1127 = vmatmul.msk.f32.gmra.mxu2 %vm617_vm7, %v604_v50  ;;  %1136 = vmatpush.msk.msra.mxu3 %vm116_vm0, %v995_v17 }
 0x5fb   :  { %940 = vmatpush.msrb.mxu2 %v889_v19 }
 0x5fd   :  { %v842_v36 = vpop.f32.mrf.mxu3 }
 0x605   :  { %v845_v29 = vpop.f32.mrf.mxu3 }
 0x659   :  { %v789_v13 = vpop.f32.mrf.mxu1 }
 0x65a   :  { %v790_v15 = vadd.f32 %v789_v13, %v743_v1 }
 0x65c   :  { %v872_v18 = vadd.f32 %v865_v14, %v790_v15 }
 0x65e   :  { %v882_v20 = vadd.f32 %v878_v16, %v872_v18 }
 0x65f   :  { %v641_v23 = vpop.f32.mrf.mxu2 }
 0x660   :  { %v886_v21 = vmax.f32 %v882_v20, 0.0  ;;  %v642_v47 = vadd.f32 %v1150_v30, %v641_v23 }
 0x662   :  { %964 = vmatmul.f32.vlgmr.msra.gmra.mxu1 %v886_v21  ;;  %v653_v48 = vand.u32 2147483647, %v642_v47  ;;  %v647_v9 = vmax.f32 %v642_v47, 0.0  ;;  %vm649_vm9 = vcmp.ne.f32.partialorder %v642_v47, %v642_v47 }
 0x664   :  { %v655_v50 = vsub.f32 0.0, %v653_v48  ;;  %v1032_v48 = vld [vmem:[%s2074_s27 + $0x10] sm:$0xff] }
 0x666   :  { %v657_v53 = vmul.f32 1.442695, %v655_v50 }
 0x667   :  { %v792_v24 = vpop.f32.mrf.mxu1 }
 0x668   :  { %v793_v26 = vadd.f32 %v792_v24, %v746_v7  ;;  %1160 = vpow2.f32 %v657_v53 }
 0x66a   :  { %v874_v27 = vadd.f32 %v868_v25, %v793_v26 }
 0x66c   :  { %v884_v31 = vadd.f32 %v878_v16, %v874_v27 }
 0x66d   :  { %v644_v32 = vpop.f32.mrf.mxu2 }
 0x66e   :  { %v1972_v33 = vadd.f32 %v1150_v30, %v644_v32  ;;  %v888_v34 = vmax.f32 %v884_v31, 0.0  ;;  %v1161_v62 = vpop.eup %1160 }
 0x66f   :  { %v661_v1 = vadd.f32 1.0, %v1161_v62  ;;  %v664_v2 = vmul.f32 -0.5, %v1161_v62  ;;  %v667_v5 = vand.u32 2147483647, %v1161_v62 }
 0x670   :  { %967 = vmatmul.f32.gmra.mxu1 %v888_v34  ;;  %v654_v12 = vand.u32 2147483647, %v1972_v33  ;;  %vm650_vm11 = vcmp.ne.f32.partialorder %v1972_v33, %v1972_v33 }
 0x671   :  { %1162 = vlog2.f32 %v661_v1  ;;  %v665_v4 = vadd.f32 1.0, %v664_v2  ;;  %vm668_vm8 = vcmp.lt.f32.partialorder %v667_v5, 0.0004427343 }
 0x672   :  { %v656_v13 = vsub.f32 0.0, %v654_v12 }
 0x673   :  { %v666_v7 = vmul.f32 %v1161_v62, %v665_v4 }
 0x674   :  { %v659_v14 = vmul.f32 1.442695, %v656_v13 }
 0x675   :  { %v766_v37 = vpop.f32.mrf.mxu2 }
 0x676   :  { %v767_v38 = vadd.f32 %v766_v37, %v720_v22  ;;  %1164 = vpow2.f32 %v659_v14 }
 0x677   :  { %v1163_v3 = vpop.eup %1162 }
 0x678   :  { %v871_v40 = vadd.f32 %v842_v36, %v767_v38  ;;  %v663_v6 = vmul.f32 0.6931472, %v1163_v3  ;;  %v648_v38 = vmax.f32 %v1972_v33, 0.0 }
 0x67a   :  { %v881_v41 = vadd.f32 %v877_v39, %v871_v40  ;;  %v669_v8 = vsel %vm668_vm8, %v666_v7, %v663_v6 }
 0x67b   :  { %v679_v10 = vadd.f32 %v669_v8, %v647_v9 }
 0x67c   :  { %v885_v42 = vmax.f32 %v881_v41, 0.0  ;;  %v1165_v19 = vpop.eup %1164  ;;  %v1041_v41 = vld [vmem:[%s2074_s27 + $0x58] sm:$0xf] }
 0x67d   :  { %v769_v43 = vpop.f32.mrf.mxu2  ;;  %v681_v11 = vsel %vm649_vm9, %v642_v47, %v679_v10  ;;  %v670_v21 = vadd.f32 1.0, %v1165_v19  ;;  %v673_v26 = vmul.f32 -0.5, %v1165_v19  ;;  %v676_v32 = vand.u32 2147483647, %v1165_v19  ;;  %1139 = vmatpush.msk.msrb.mxu0 %vm116_vm0, %v1041_v41  ;;  %v1033_v47 = vld [vmem:[%s2074_s27 + $0x18] sm:$0xff] }
 0x67e   :  { %v770_v44 = vadd.f32 %v769_v43, %v723_v28  ;;  %941 = vmatmul.f32.vlgmr.msrb.gmra.mxu2 %v885_v42  ;;  %v1040_v42 = vld [vmem:[%s2074_s27 + $0x50] sm:$0xff]  ;;  %v1039_v43 = vld [vmem:[%s2074_s27 + $0x48] sm:$0xff] }
 0x67f   :  { %v674_v30 = vadd.f32 1.0, %v673_v26  ;;  %vm677_vm10 = vcmp.lt.f32.partialorder %v676_v32, 0.0004427343  ;;  %1056 = vmatpush.msrb.mxu0 %v1040_v42 }
 0x680   :  { %v873_v45 = vadd.f32 %v845_v29, %v770_v44  ;;  %v1037_v29 = vld [vmem:[%s2074_s27 + $0x38] sm:$0xff]  ;;  %v1036_v44 = vld [vmem:[%s2074_s27 + $0x30] sm:$0xff] }
 0x681   :  { %v675_v36 = vmul.f32 %v1165_v19, %v674_v30  ;;  %1057 = vmatpush.msrb.mxu0 %v1039_v43 }
 0x682   :  { %v883_v46 = vadd.f32 %v877_v39, %v873_v45  ;;  %v1035_v45 = vld [vmem:[%s2074_s27 + $0x28] sm:$0xff] }
 0x684   :  { %v887_v35 = vmax.f32 %v883_v46, 0.0  ;;  %v1034_v46 = vld [vmem:[%s2074_s27 + $0x20] sm:$0xff] }
 0x686   :  { %944 = vmatmul.f32.gmra.mxu2 %v887_v35 }
 0x6df   :  { %v965_v54 = vpop.f32.mrf.mxu1 }
 0x6ed   :  { %v968_v60 = vpop.f32.mrf.mxu1 }
 0x701   :  { %v942_v51 = vpop.f32.mrf.mxu2 }
 0x702   :  { %v943_v52 = vadd.f32 %v1151_v49, %v942_v51 }
 0x704   :  { %v966_v55 = vadd.f32 %v965_v54, %v943_v52  ;;  %v1031_v54 = vld [vmem:[%s2074_s27 + $0x8] sm:$0xff] }
 0x706   :  { %v971_v56 = vmax.f32 %v966_v55, 0.0  ;;  %v1030_v55 = vld [vmem:[%s2074_s27] sm:$0xff] }
 0x708   :  { %v973_v57 = vsel %vm464_vm5, %v971_v56, -inf }
 0x709   :  { %v945_v58 = vpop.f32.mrf.mxu2  ;;  %974 = vmax.xlane.f32.xlu2 %v973_v57  ;;  %v1176_v57 = vld [vmem:[%s2102_s4] sm:$0xff] }
 0x70a   :  { %v946_v59 = vadd.f32 %v1151_v49, %v945_v58 }
 0x70c   :  { %v969_v61 = vadd.f32 %v968_v60, %v946_v59  ;;  %v1177_v60 = vld [vmem:[%s2102_s4 + $0x8] sm:$0xff] }
 0x70e   :  { %v972_v63 = vmax.f32 %v969_v61, 0.0 }
 0x710   :  { %v976_v0 = vsel %vm464_vm5, %v972_v63, -inf }
 0x711   :  { %977 = vmax.xlane.f32.xlu2 %v976_v0 }
 0x729   :  { %1076 = vrot.lane.b32.xlu2 %v681_v11, %s1178_s25 }
 0x77c   :  { %v975_v15 = vpop.xlane.xlu2 %974 }
 0x77d   :  { %v979_v16 = vsub.f32 %v971_v56, %v975_v15 }
 0x77f   :  { %v981_v18 = vmul.f32 1.442695, %v979_v16 }
 0x781   :  { %1166 = vpow2.f32 %v981_v18 }
 0x782   :  { %1168 = vlog2.f32 %v670_v21 }
 0x784   :  { %v978_v20 = vpop.xlane.xlu2 %977 }
 0x785   :  { %v980_v22 = vsub.f32 %v972_v63, %v978_v20 }
 0x787   :  { %v1167_v23 = vpop.eup %1166  ;;  %v983_v24 = vmul.f32 1.442695, %v980_v22 }
 0x788   :  { %v985_v25 = vsel %vm464_vm5, %v1167_v23, 0.0  ;;  %v1169_v27 = vpop.eup %1168 }
 0x789   :  { %1170 = vpow2.f32 %v983_v24  ;;  %986 = vadd.xlane.f32.xlu0 %v985_v25  ;;  %v672_v34 = vmul.f32 0.6931472, %v1169_v27 }
 0x78b   :  { %v678_v37 = vsel %vm677_vm10, %v675_v36, %v672_v34 }
 0x78c   :  { %v680_v39 = vadd.f32 %v678_v37, %v648_v38  ;;  %v1077_v62 = vpop.permute.xlu2 %1076 }
 0x78e   :  { %v682_v40 = vsel %vm650_vm11, %v1972_v33, %v680_v39  ;;  %v1038_v33 = vld [vmem:[%s2074_s27 + $0x40] sm:$0xff] }
 0x78f   :  { %v1171_v28 = vpop.eup %1170  ;;  %1058 = vmatpush.msrb.mxu0 %v1038_v33 }
 0x790   :  { %v988_v31 = vsel %vm464_vm5, %v1171_v28, 0.0 }
 0x791   :  { %989 = vadd.xlane.f32.xlu1 %v988_v31  ;;  %1059 = vmatpush.msrb.mxu0 %v1037_v29 }
 0x793   :  { %1060 = vmatpush.msrb.mxu0 %v1036_v44 }
 0x795   :  { %1061 = vmatpush.msrb.mxu0 %v1035_v45 }
 0x797   :  { %1062 = vmatpush.msrb.mxu0 %v1034_v46 }
 0x799   :  { %1063 = vmatpush.msrb.mxu0 %v1033_v47 }
 0x79b   :  { %1064 = vmatpush.msrb.mxu0 %v1032_v48 }
 0x79d   :  { %1078 = vrot.lane.b32.xlu0 %v682_v40, %s1178_s25  ;;  %1065 = vmatpush.msrb.mxu0 %v1031_v54 }
 0x79f   :  { %1066 = vmatpush.msrb.mxu0 %v1030_v55 }
 0x7fc   :  { %v987_v35 = vpop.xlane.xlu0 %986 }
 0x7fd   :  { %1172 = vrcp.f32 %v987_v35 }
 0x803   :  { %v1173_v49 = vpop.eup %1172 }
 0x804   :  { %v993_v50 = vmul.f32 %v1173_v49, %v1167_v23  ;;  %v990_v51 = vpop.xlane.xlu1 %989 }
 0x805   :  { %1174 = vrcp.f32 %v990_v51 }
 0x806   :  { %1137 = vmatmul.msk.f32.vlgmr.msra.gmra.mxu3 %vm464_vm5, %v993_v50 }
 0x80b   :  { %v1175_v52 = vpop.eup %1174 }
 0x80c   :  { %v994_v53 = vmul.f32 %v1175_v52, %v1171_v28 }
 0x80e   :  { %1138 = vmatmul.msk.f32.gmra.mxu3 %vm464_vm5, %v994_v53 }
 0x80f   :  { %v1079_v1 = vpop.permute.xlu0 %1078 }
 0x889   :  { %v1022_v56 = vpop.f32.mrf.mxu3 }
 0x88a   :  { %v1028_v58 = vmul.f32 %v1176_v57, %v1022_v56 }
 0x88c   :  { %1140 = vmatmul.msk.f32.vlgmr.msrb.gmra.mxu0 %vm109_vm1, %v1028_v58 }
 0x891   :  { %v1025_v59 = vpop.f32.mrf.mxu3 }
 0x892   :  { %v1029_v61 = vmul.f32 %v1177_v60, %v1025_v59 }
 0x894   :  { %1141 = vmatmul.msk.f32.gmra.mxu0 %vm109_vm1, %v1029_v61 }
 0x909   :  { %v1068_v63 = vpop.f32.mrf.mxu0 }
 0x90a   :  { %v1083_v0 = vsel %vm1082_vm12, %v1068_v63, %v1077_v62 }
 0x90b   :  { %1085 = vst.msk [vmem:[%s2075_s28] sm:$0xff] %vm464_vm5, %v1083_v0 }
 0x911   :  { %v1071_v2 = vpop.f32.mrf.mxu0 }
 0x912   :  { %v1084_v3 = vsel %vm1082_vm12, %v1071_v2, %v1079_v1 }
 0x913   :  { %1086 = vst.msk [vmem:[%s2075_s28 + $0x8] sm:$0xff] %vm464_vm5, %v1084_v3 }

</bundles_post_ra>
